<compile_context>
chip_gen: v7x
topology: tpu7x:2x2x1
jax: 0.10.0
libtpu: 0.0.40
codegen_flags: <defaults>
</compile_context>

<pallas_src>
import jax
import jax.numpy as jnp
from jax.experimental import pallas as pl
from jax.experimental.pallas import tpu as pltpu

HAND_SIZE = 8
EMB = 32            # action_embedding_size
LSTM_H = 32         # lstm_hidden_size
JOKER_F = 172       # LSTM input_size
JOKER_PAD = 176     # padded to a multiple of 16 (bf16 sublane packing)
HIDDEN = 256        # hidden_size
CONTEXT = 128       # context_size
NONSEQ = 4          # chips, discards_left, hands_left, log_chip_goal
XCAT = EMB * HAND_SIZE + NONSEQ   # 260 = flat_hand (256) + non_sequence (4)
XCAT_PAD = 384                    # padded to a multiple of 128 (lane-dense loads)


def _leaky_relu(x, slope=0.01):
    return jnp.where(x > 0, x, slope * x)


def balatro_kernel(maxlen_ref,                     # scalar prefetch (SMEM): (nb,) int32
                   jok_ref, mask_ref, xcat_ref,    # batch-tiled operands
                   wih_ref, whh_ref, blstm_ref,    # LSTM weights (i/f/o cols pre-scaled 0.5)
                   w1h_ref, w1cat_ref, b1_ref,
                   w2_ref, b2_ref,
                   out_ref,
                   gx_ref, h_ref, c_ref):          # VMEM scratch
    T, B, F = jok_ref.shape                        # (T, TB, 176)
    H = LSTM_H
    max_len = maxlen_ref[pl.program_id(0)]

    # ---- hoisted LSTM input projection: ONE bf16 MXU matmul for all timesteps ----
    jok2d = jok_ref[...].reshape(T * B, F)         # layout no-op (B % 16 == 0)
    gx_ref[...] = jnp.dot(jok2d, wih_ref[...], preferred_element_type=jnp.float32)

    whh = whh_ref[...]                                          # (32, 128) f32
    b_lstm = jnp.broadcast_to(blstm_ref[...], (B, 4 * H))       # hoisted broadcast
    h_ref[...] = jnp.zeros_like(h_ref)
    c_ref[...] = jnp.zeros_like(c_ref)

    # ---- masked LSTM recurrence (pack_padded_sequence via precomputed mask) ----
    def step(t, carry):
        @pl.when(t < max_len)                      # skip timesteps dead for the whole tile
        def _():
            h = h_ref[...]
            c = c_ref[...]
            row = pl.multiple_of(t * B, B)
            gates = (gx_ref[pl.ds(row, B), :]
                     + jnp.dot(h, whh, preferred_element_type=jnp.float32)
                     + b_lstm)                                   # (B, 4H)
            # single EUP pass: sigmoid(x) = 0.5*tanh(x/2)+0.5 (i/f/o pre-scaled by 0.5)
            th = jnp.tanh(gates)
            sg = 0.5 * th + 0.5
            i_g = sg[:, 0:H]
            f_g = sg[:, H:2 * H]
            g_g = th[:, 2 * H:3 * H]
            o_g = sg[:, 3 * H:4 * H]
            c_new = f_g * c + i_g * g_g
            h_new = o_g * jnp.tanh(c_new)
            keep = mask_ref[t] > 0.0               # precomputed (B, H) step mask
            h_ref[...] = jnp.where(keep, h_new, h)
            c_ref[...] = jnp.where(keep, c_new, c)
        return carry

    jax.lax.fori_loop(0, T, step, 0, unroll=min(T, 8))

    joker_ht = h_ref[...]                                        # (B, 32)

    # ---- hidden_layer_1 (hand-bag folded into w1cat in the wrapper) ----
    hidden = _leaky_relu(
        jnp.dot(joker_ht, w1h_ref[...], preferred_element_type=jnp.float32)
        + jnp.dot(xcat_ref[...], w1cat_ref[...], preferred_element_type=jnp.float32)
        + b1_ref[...])                                           # (B, 256)

    # ---- context_layer ----
    out_ref[...] = _leaky_relu(
        jnp.dot(hidden, w2_ref[...], preferred_element_type=jnp.float32)
        + b2_ref[...])                                           # (B, 128)


def init_params(key):
    ks = jax.random.split(key, 9)
    in1 = LSTM_H + EMB + EMB * HAND_SIZE + NONSEQ                # 324

    def rnd(k, shape, fan_in):
        return jax.random.normal(k, shape, jnp.float32) / jnp.sqrt(jnp.float32(fan_in))

    return dict(
        emb=rnd(ks[0], (52, EMB), 1.0),                          # nn.Embedding(52, 32)
        w_ih=rnd(ks[1], (4 * LSTM_H, JOKER_F), JOKER_F),         # LSTM weight_ih_l0
        w_hh=rnd(ks[2], (4 * LSTM_H, LSTM_H), LSTM_H),           # LSTM weight_hh_l0
        b_ih=rnd(ks[3], (4 * LSTM_H,), LSTM_H),
        b_hh=rnd(ks[4], (4 * LSTM_H,), LSTM_H),
        w1=rnd(ks[5], (HIDDEN, in1), in1),                       # hidden_layer_1
        b1=rnd(ks[6], (HIDDEN,), in1),
        w2=rnd(ks[7], (CONTEXT, HIDDEN), HIDDEN),                # context_layer
        b2=rnd(ks[8], (CONTEXT,), HIDDEN),
    )


def _pad_axis0(x, n, value=0):
    if x.shape[0] == n:
        return x
    pad = [(0, n - x.shape[0])] + [(0, 0)] * (x.ndim - 1)
    return jnp.pad(x, pad, constant_values=value)


def balatro_forward(params, obs, *, batch_tile=128):
    H = LSTM_H
    # ----- glue: feature assembly (matches the torch forward) -----
    non_sequence = jnp.concatenate(
        [obs['chips'], obs['discards_left'], obs['hands_left'], obs['log_chip_goal']],
        axis=1).astype(jnp.float32)                              # (B, 4)

    hand_idx = obs['hand_indices'].astype(jnp.int32)             # (B, 8)
    hand_emb = jnp.take(params['emb'], hand_idx, axis=0)         # (B, 8, 32)
    B = hand_emb.shape[0]
    flat_hand = hand_emb.reshape(B, -1)                          # (B, 256)

    jokers = jnp.concatenate(
        [obs['joker_cost'][..., None], obs['joker_name'],
         obs['joker_rarity'], obs['joker_flags']], axis=2).astype(jnp.float32)  # (B, T, 172)
    T = jokers.shape[1]

    num_jokers = obs['owned_jokers_count'].astype(jnp.int32).reshape(B)
    lengths = jnp.where(num_jokers == 0, 1, num_jokers)          # (B,)

    # ----- batch padding / tiling (16-row alignment for bf16 sublane packing) -----
    Bp = ((B + 15) // 16) * 16
    TB = min(Bp, max(16, (batch_tile // 16) * 16))
    Bp = ((Bp + TB - 1) // TB) * TB
    nb = Bp // TB

    xcat = jnp.concatenate([flat_hand, non_sequence], axis=1)    # (B, 260)
    xcat = _pad_axis0(xcat, Bp)
    xcat = jnp.pad(xcat, ((0, 0), (0, XCAT_PAD - XCAT)))         # lane-dense (Bp, 384)

    lengths_p = _pad_axis0(lengths, Bp, value=0)                 # padded rows: zero steps
    # pack_padded_sequence mask precomputed as a (T, Bp, H) f32 slab
    mask = (jnp.arange(T)[:, None] < lengths_p[None, :]).astype(jnp.float32)   # (T, Bp)
    mask3 = jnp.broadcast_to(mask[:, :, None], (T, Bp, H))
    # per-tile max length for the @pl.when dead-timestep skip (scalar prefetch -> SMEM)
    maxlen = jnp.minimum(jnp.max(lengths_p.reshape(nb, TB), axis=1), T).astype(jnp.int32)

    jok = _pad_axis0(jokers, Bp)                                 # (Bp, T, 172)
    jok = jnp.transpose(jok, (1, 0, 2))                          # time-major (T, Bp, 172)
    jok = jnp.pad(jok, ((0, 0), (0, 0), (0, JOKER_PAD - JOKER_F)))
    jok = jok.astype(jnp.bfloat16)                               # bf16 MXU operand, half DMA

    # ----- weight prep -----
    # sigmoid-via-tanh identity: scale i/f/o gate columns of W_ih / W_hh / bias by 0.5
    col_scale = jnp.concatenate(
        [jnp.full((1, H), 0.5, jnp.float32), jnp.full((1, H), 0.5, jnp.float32),
         jnp.ones((1, H), jnp.float32), jnp.full((1, H), 0.5, jnp.float32)], axis=1)  # (1,128)
    wih_t = params['w_ih'].T * col_scale                         # (172, 128)
    wih_t = jnp.pad(wih_t, ((0, JOKER_PAD - JOKER_F), (0, 0))).astype(jnp.bfloat16)
    whh_t = params['w_hh'].T * col_scale                         # (32, 128) f32
    b_lstm = (params['b_ih'] + params['b_hh']).reshape(1, -1) * col_scale

    w1_t = params['w1'].T                                        # (324, 256)
    w1h = w1_t[:H]                                               # joker_ht rows   (32, 256)
    w1s = w1_t[H:H + EMB]                                        # hand_bag rows   (32, 256)
    w1f = w1_t[H + EMB:H + EMB + EMB * HAND_SIZE]                # flat_hand rows  (256, 256)
    w1n = w1_t[H + EMB + EMB * HAND_SIZE:]                       # non_seq rows    (4, 256)
    # fold the hand-bag branch: sum_k hand_emb[:,k,:] @ w1s == flat_hand @ tile(w1s)
    w1f_fused = w1f + jnp.tile(w1s, (HAND_SIZE, 1))              # (256, 256)
    w1cat = jnp.concatenate(
        [w1f_fused, w1n, jnp.zeros((XCAT_PAD - XCAT, HIDDEN), jnp.float32)], axis=0)  # (384, 256)
    b1 = params['b1'].reshape(1, -1)
    w2_t = params['w2'].T                                        # (256, 128)
    b2 = params['b2'].reshape(1, -1)

    operands = (maxlen, jok, mask3, xcat, wih_t, whh_t, b_lstm,
                w1h, w1cat, b1, w2_t, b2)

    # ----- cost / VMEM budgeting -----
    flops = (2 * T * Bp * JOKER_PAD * 4 * H          # hoisted input projection
             + T * 2 * Bp * H * 4 * H                # recurrence h @ Whh (upper bound)
             + 2 * Bp * (H + XCAT_PAD) * HIDDEN      # hidden_layer_1
             + 2 * Bp * HIDDEN * CONTEXT)            # context_layer
    transcendentals = T * Bp * (4 * H + H)
    bytes_accessed = (jok.size * 2 + wih_t.size * 2 + maxlen.size * 4
                      + (mask3.size + xcat.size + whh_t.size + b_lstm.size + w1h.size
                         + w1cat.size + b1.size + w2_t.size + b2.size) * 4
                      + Bp * CONTEXT * 4)

    tile_bytes = 2 * (T * TB * JOKER_PAD * 2 + T * TB * H * 4
                      + TB * XCAT_PAD * 4 + TB * CONTEXT * 4)    # double-buffered tiles
    weight_bytes = 2 * (wih_t.size * 2 + (whh_t.size + b_lstm.size + w1h.size
                        + w1cat.size + b1.size + w2_t.size + b2.size) * 4)
    scratch_bytes = (T * TB * 4 * H + 2 * TB * H) * 4
    vmem_limit = int(min(max(2 * (tile_bytes + weight_bytes + scratch_bytes), 32 << 20),
                         56 << 20))                              # <= v7x 64 MiB physical

    grid_spec = pltpu.PrefetchScalarGridSpec(
        num_scalar_prefetch=1,
        grid=(nb,),
        in_specs=[
            pl.BlockSpec((T, TB, JOKER_PAD), lambda i, ml: (0, i, 0)),   # jok (bf16)
            pl.BlockSpec((T, TB, H), lambda i, ml: (0, i, 0)),           # mask
            pl.BlockSpec((TB, XCAT_PAD), lambda i, ml: (i, 0)),          # xcat
            pl.BlockSpec((JOKER_PAD, 4 * H), lambda i, ml: (0, 0)),      # wih (bf16)
            pl.BlockSpec((H, 4 * H), lambda i, ml: (0, 0)),              # whh
            pl.BlockSpec((1, 4 * H), lambda i, ml: (0, 0)),              # b_lstm
            pl.BlockSpec((H, HIDDEN), lambda i, ml: (0, 0)),             # w1h
            pl.BlockSpec((XCAT_PAD, HIDDEN), lambda i, ml: (0, 0)),      # w1cat
            pl.BlockSpec((1, HIDDEN), lambda i, ml: (0, 0)),             # b1
            pl.BlockSpec((HIDDEN, CONTEXT), lambda i, ml: (0, 0)),       # w2
            pl.BlockSpec((1, CONTEXT), lambda i, ml: (0, 0)),            # b2
        ],
        out_specs=pl.BlockSpec((TB, CONTEXT), lambda i, ml: (i, 0)),
        scratch_shapes=[
            pltpu.VMEM((T * TB, 4 * H), jnp.float32),   # gx: hoisted gate projections
            pltpu.VMEM((TB, H), jnp.float32),           # h state
            pltpu.VMEM((TB, H), jnp.float32),           # c state
        ],
    )

    context = pl.pallas_call(
        balatro_kernel,
        out_shape=jax.ShapeDtypeStruct((Bp, CONTEXT), jnp.float32),
        grid_spec=grid_spec,
        compiler_params=pltpu.CompilerParams(
            dimension_semantics=("parallel",),
            vmem_limit_bytes=vmem_limit),
        cost_estimate=pl.CostEstimate(flops=flops,
                                      transcendentals=transcendentals,
                                      bytes_accessed=bytes_accessed),
    )(*operands)
    return context[:B], []                                       # (self._last_context, [])


def reference_forward(params, obs):
    """Pure-JAX reference, mirrors the torch forward (unfused f32 weights)."""
    non_sequence = jnp.concatenate(
        [obs['chips'], obs['discards_left'], obs['hands_left'], obs['log_chip_goal']],
        axis=1).astype(jnp.float32)
    hand_idx = obs['hand_indices'].astype(jnp.int32)
    hand_emb = jnp.take(params['emb'], hand_idx, axis=0)
    B = hand_emb.shape[0]
    flat_hand = hand_emb.reshape(B, -1)
    hand_bag = jnp.sum(hand_emb, axis=1)
    jokers = jnp.concatenate(
        [obs['joker_cost'][..., None], obs['joker_name'],
         obs['joker_rarity'], obs['joker_flags']], axis=2).astype(jnp.float32)
    num_jokers = obs['owned_jokers_count'].astype(jnp.int32).reshape(B)
    lengths = jnp.where(num_jokers == 0, 1, num_jokers).reshape(B, 1)
    wih_t, whh_t = params['w_ih'].T, params['w_hh'].T
    b_lstm = (params['b_ih'] + params['b_hh'])[None, :]
    h = jnp.zeros((B, LSTM_H), jnp.float32)
    c = jnp.zeros((B, LSTM_H), jnp.float32)
    for t in range(jokers.shape[1]):
        gates = jokers[:, t, :] @ wih_t + h @ whh_t + b_lstm
        i = jax.nn.sigmoid(gates[:, :LSTM_H])
        f = jax.nn.sigmoid(gates[:, LSTM_H:2 * LSTM_H])
        g = jnp.tanh(gates[:, 2 * LSTM_H:3 * LSTM_H])
        o = jax.nn.sigmoid(gates[:, 3 * LSTM_H:])
        c_new = f * c + i * g
        h_new = o * jnp.tanh(c_new)
        m = (t < lengths).astype(jnp.float32)
        h = m * h_new + (1.0 - m) * h
        c = m * c_new + (1.0 - m) * c
    combined = jnp.concatenate([h, hand_bag, flat_hand, non_sequence], axis=1)
    hidden = _leaky_relu(combined @ params['w1'].T + params['b1'][None, :])
    ctx = _leaky_relu(hidden @ params['w2'].T + params['b2'][None, :])
    return ctx


if __name__ == "__main__":
    key = jax.random.PRNGKey(0)
    pkey, okey = jax.random.split(key)
    params = init_params(pkey)

    B, T = 4, 5
    name_dim, rar_dim, flg_dim = 160, 4, 7      # 1 + 160 + 4 + 7 = 172
    ks = jax.random.split(okey, 9)
    obs = {
        'chips': jax.random.uniform(ks[0], (B, 1), jnp.float32),
        'discards_left': jax.random.uniform(ks[1], (B, 1), jnp.float32),
        'hands_left': jax.random.uniform(ks[2], (B, 1), jnp.float32),
        'log_chip_goal': jax.random.uniform(ks[3], (B, 1), jnp.float32),
        'hand_indices': jax.random.randint(ks[4], (B, HAND_SIZE), 0, 52),
        'joker_cost': jax.random.uniform(ks[5], (B, T), jnp.float32),
        'joker_name': jax.random.uniform(ks[6], (B, T, name_dim), jnp.float32),
        'joker_rarity': jax.random.uniform(ks[7], (B, T, rar_dim), jnp.float32),
        'joker_flags': jax.random.uniform(ks[8], (B, T, flg_dim), jnp.float32),
        'owned_jokers_count': jnp.array([3, 0, 5, 1], dtype=jnp.int32),
    }

    ctx, state = balatro_forward(params, obs)
    ctx = jax.block_until_ready(ctx)

    assert ctx.shape == (B, CONTEXT)
    assert bool(jnp.all(jnp.isfinite(ctx)))
    ref = reference_forward(params, obs)
    # tolerance relaxed vs rev 1: bf16 input-projection operands + sigmoid-via-tanh
    # perturb low-order bits (acknowledged as acceptable in the perf review).
    assert bool(jnp.allclose(ctx, ref, atol=5e-3, rtol=5e-3)), \
        float(jnp.max(jnp.abs(ctx - ref)))
    print("KERNEL_OK")
</pallas_src>

<mosaic_0001>
module attributes {stable_mosaic.version = 11 : i64} {
  func.func @balatro_kernel(%arg0: i32, %arg1: memref<1xi32, #tpu.memory_space<smem>>, %arg2: memref<5x16x176xbf16, #tpu.memory_space<vmem>>, %arg3: memref<5x16x32xf32, #tpu.memory_space<vmem>>, %arg4: memref<16x384xf32, #tpu.memory_space<vmem>>, %arg5: memref<176x128xbf16, #tpu.memory_space<vmem>>, %arg6: memref<32x128xf32, #tpu.memory_space<vmem>>, %arg7: memref<1x128xf32, #tpu.memory_space<vmem>>, %arg8: memref<32x256xf32, #tpu.memory_space<vmem>>, %arg9: memref<384x256xf32, #tpu.memory_space<vmem>>, %arg10: memref<1x256xf32, #tpu.memory_space<vmem>>, %arg11: memref<256x128xf32, #tpu.memory_space<vmem>>, %arg12: memref<1x128xf32, #tpu.memory_space<vmem>>, %arg13: memref<16x128xf32, #tpu.memory_space<vmem>>, %arg14: memref<80x128xf32, #tpu.memory_space<vmem>>, %arg15: memref<16x32xf32, #tpu.memory_space<vmem>>, %arg16: memref<16x32xf32, #tpu.memory_space<vmem>>) attributes {dimension_semantics = [#tpu.dimension_semantics<parallel>], iteration_bounds = array<i64: 1>, scalar_prefetch = 1 : i64, scratch_operands = 3 : i64, tpu.core_type = #tpu.core_type<tc>, window_params = [{transform_indices = @transform_0, window_bounds = array<i64: 5, 16, 176>}, {transform_indices = @transform_1, window_bounds = array<i64: 5, 16, 32>}, {transform_indices = @transform_2, window_bounds = array<i64: 16, 384>}, {pipeline_mode = #tpu.pipeline_mode<synchronous>, transform_indices = @transform_3, window_bounds = array<i64: 176, 128>}, {pipeline_mode = #tpu.pipeline_mode<synchronous>, transform_indices = @transform_4, window_bounds = array<i64: 32, 128>}, {pipeline_mode = #tpu.pipeline_mode<synchronous>, transform_indices = @transform_5, window_bounds = array<i64: 1, 128>}, {pipeline_mode = #tpu.pipeline_mode<synchronous>, transform_indices = @transform_6, window_bounds = array<i64: 32, 256>}, {pipeline_mode = #tpu.pipeline_mode<synchronous>, transform_indices = @transform_7, window_bounds = array<i64: 384, 256>}, {pipeline_mode = #tpu.pipeline_mode<synchronous>, transform_indices = @transform_8, window_bounds = array<i64: 1, 256>}, {pipeline_mode = #tpu.pipeline_mode<synchronous>, transform_indices = @transform_9, window_bounds = array<i64: 256, 128>}, {pipeline_mode = #tpu.pipeline_mode<synchronous>, transform_indices = @transform_10, window_bounds = array<i64: 1, 128>}, {transform_indices = @transform_11, window_bounds = array<i64: 16, 128>}]} {
    %0 = arith.index_cast %arg0 : i32 to index
    %1 = memref.load %arg1[%0] : memref<1xi32, #tpu.memory_space<smem>>
    %c0 = arith.constant 0 : index
    %c0_0 = arith.constant 0 : index
    %c0_1 = arith.constant 0 : index
    %2 = vector.load %arg2[%c0, %c0_0, %c0_1] : memref<5x16x176xbf16, #tpu.memory_space<vmem>>, vector<5x16x176xbf16>
    %3 = vector.shape_cast %2 : vector<5x16x176xbf16> to vector<80x176xbf16>
    %c0_2 = arith.constant 0 : index
    %c0_3 = arith.constant 0 : index
    %4 = vector.load %arg5[%c0_2, %c0_3] : memref<176x128xbf16, #tpu.memory_space<vmem>>, vector<176x128xbf16>
    %cst = arith.constant dense<0.000000e+00> : vector<80x128xf32>
    %5 = tpu.matmul %3, %4, %cst {dimension_numbers = #tpu.dot_dimension_numbers<[1], [0], [0], [1], [0, 0, 1, 1], [], []>} : vector<80x176xbf16>, vector<176x128xbf16>, vector<80x128xf32> -> vector<80x128xf32>
    %c0_4 = arith.constant 0 : index
    %c0_5 = arith.constant 0 : index
    %6 = vector.load %arg14[%c0_4, %c0_5] : memref<80x128xf32, #tpu.memory_space<vmem>>, vector<80x128xf32>
    tpu.vector_store %arg14[%c0_4, %c0_5], %5 {strides = array<i32>} : memref<80x128xf32, #tpu.memory_space<vmem>>, vector<80x128xf32>,
    %c0_6 = arith.constant 0 : index
    %c0_7 = arith.constant 0 : index
    %7 = vector.load %arg6[%c0_6, %c0_7] : memref<32x128xf32, #tpu.memory_space<vmem>>, vector<32x128xf32>
    %c0_8 = arith.constant 0 : index
    %c0_9 = arith.constant 0 : index
    %8 = vector.load %arg7[%c0_8, %c0_9] : memref<1x128xf32, #tpu.memory_space<vmem>>, vector<1x128xf32>
    %9 = vector.shape_cast %8 : vector<1x128xf32> to vector<1x128xf32>
    %10 = vector.broadcast %9 : vector<1x128xf32> to vector<16x128xf32>
    %cst_10 = arith.constant 0.000000e+00 : f32
    %11 = vector.broadcast %cst_10 : f32 to vector<16x32xf32>
    %c0_11 = arith.constant 0 : index
    %c0_12 = arith.constant 0 : index
    %12 = vector.load %arg15[%c0_11, %c0_12] : memref<16x32xf32, #tpu.memory_space<vmem>>, vector<16x32xf32>
    tpu.vector_store %arg15[%c0_11, %c0_12], %11 {strides = array<i32>} : memref<16x32xf32, #tpu.memory_space<vmem>>, vector<16x32xf32>,
    %cst_13 = arith.constant 0.000000e+00 : f32
    %13 = vector.broadcast %cst_13 : f32 to vector<16x32xf32>
    %c0_14 = arith.constant 0 : index
    %c0_15 = arith.constant 0 : index
    %14 = vector.load %arg16[%c0_14, %c0_15] : memref<16x32xf32, #tpu.memory_space<vmem>>, vector<16x32xf32>
    tpu.vector_store %arg16[%c0_14, %c0_15], %13 {strides = array<i32>} : memref<16x32xf32, #tpu.memory_space<vmem>>, vector<16x32xf32>,
    %c0_i32 = arith.constant 0 : i32
    %15 = arith.cmpi slt, %c0_i32, %1 : i32
    %16 = arith.extui %15 : i1 to i32
    %c0_i32_16 = arith.constant 0 : i32
    %17 = arith.cmpi ne, %16, %c0_i32_16 : i32
    scf.if %17 {
      %c0_44 = arith.constant 0 : index
      %c0_45 = arith.constant 0 : index
      %56 = vector.load %arg15[%c0_44, %c0_45] : memref<16x32xf32, #tpu.memory_space<vmem>>, vector<16x32xf32>
      %c0_46 = arith.constant 0 : index
      %c0_47 = arith.constant 0 : index
      %57 = vector.load %arg16[%c0_46, %c0_47] : memref<16x32xf32, #tpu.memory_space<vmem>>, vector<16x32xf32>
      %c16_i32 = arith.constant 16 : i32
      %58 = arith.muli %c0_i32, %c16_i32 : i32
      %59 = tpu.assume_multiple %58, 16 : i32
      %60 = arith.index_cast %59 : i32 to index
      %c0_48 = arith.constant 0 : index
      %61 = vector.load %arg14[%60, %c0_48] : memref<80x128xf32, #tpu.memory_space<vmem>>, vector<16x128xf32>
      %cst_49 = arith.constant dense<0.000000e+00> : vector<16x128xf32>
      %62 = tpu.matmul %56, %7, %cst_49 {dimension_numbers = #tpu.dot_dimension_numbers<[1], [0], [0], [1], [0, 0, 1, 1], [], []>} : vector<16x32xf32>, vector<32x128xf32>, vector<16x128xf32> -> vector<16x128xf32>
      %63 = arith.addf %61, %62 : vector<16x128xf32>
      %64 = arith.addf %63, %10 : vector<16x128xf32>
      %65 = math.tanh %64 : vector<16x128xf32>
      %cst_50 = arith.constant 5.000000e-01 : f32
      %66 = vector.broadcast %cst_50 : f32 to vector<16x128xf32>
      %67 = arith.mulf %66, %65 : vector<16x128xf32>
      %cst_51 = arith.constant 5.000000e-01 : f32
      %68 = vector.broadcast %cst_51 : f32 to vector<16x128xf32>
      %69 = arith.addf %67, %68 : vector<16x128xf32>
      %70 = vector.extract_strided_slice %69 {offsets = [0, 0], sizes = [16, 32], strides = [1, 1]} : vector<16x128xf32> to vector<16x32xf32>
      %71 = vector.extract_strided_slice %69 {offsets = [0, 32], sizes = [16, 32], strides = [1, 1]} : vector<16x128xf32> to vector<16x32xf32>
      %72 = vector.extract_strided_slice %65 {offsets = [0, 64], sizes = [16, 32], strides = [1, 1]} : vector<16x128xf32> to vector<16x32xf32>
      %73 = vector.extract_strided_slice %69 {offsets = [0, 96], sizes = [16, 32], strides = [1, 1]} : vector<16x128xf32> to vector<16x32xf32>
      %74 = arith.mulf %71, %57 : vector<16x32xf32>
      %75 = arith.mulf %70, %72 : vector<16x32xf32>
      %76 = arith.addf %74, %75 : vector<16x32xf32>
      %77 = math.tanh %76 : vector<16x32xf32>
      %78 = arith.mulf %73, %77 : vector<16x32xf32>
      %79 = arith.index_cast %c0_i32 : i32 to index
      %c0_52 = arith.constant 0 : index
      %c0_53 = arith.constant 0 : index
      %80 = vector.load %arg3[%79, %c0_52, %c0_53] : memref<5x16x32xf32, #tpu.memory_space<vmem>>, vector<1x16x32xf32>
      %81 = vector.shape_cast %80 : vector<1x16x32xf32> to vector<16x32xf32>
      %cst_54 = arith.constant 0.000000e+00 : f32
      %82 = vector.broadcast %cst_54 : f32 to vector<16x32xf32>
      %83 = arith.cmpf ogt, %81, %82 : vector<16x32xf32>
      %84 = arith.select %83, %78, %56 : vector<16x32xi1>, vector<16x32xf32>
      %c0_55 = arith.constant 0 : index
      %c0_56 = arith.constant 0 : index
      %85 = vector.load %arg15[%c0_55, %c0_56] : memref<16x32xf32, #tpu.memory_space<vmem>>, vector<16x32xf32>
      tpu.vector_store %arg15[%c0_55, %c0_56], %84 {strides = array<i32>} : memref<16x32xf32, #tpu.memory_space<vmem>>, vector<16x32xf32>,
      %86 = arith.select %83, %76, %57 : vector<16x32xi1>, vector<16x32xf32>
      %c0_57 = arith.constant 0 : index
      %c0_58 = arith.constant 0 : index
      %87 = vector.load %arg16[%c0_57, %c0_58] : memref<16x32xf32, #tpu.memory_space<vmem>>, vector<16x32xf32>
      tpu.vector_store %arg16[%c0_57, %c0_58], %86 {strides = array<i32>} : memref<16x32xf32, #tpu.memory_space<vmem>>, vector<16x32xf32>,
    } else {
    }
    %c1_i32 = arith.constant 1 : i32
    %18 = arith.cmpi slt, %c1_i32, %1 : i32
    %19 = arith.extui %18 : i1 to i32
    %c0_i32_17 = arith.constant 0 : i32
    %20 = arith.cmpi ne, %19, %c0_i32_17 : i32
    scf.if %20 {
      %c0_44 = arith.constant 0 : index
      %c0_45 = arith.constant 0 : index
      %56 = vector.load %arg15[%c0_44, %c0_45] : memref<16x32xf32, #tpu.memory_space<vmem>>, vector<16x32xf32>
      %c0_46 = arith.constant 0 : index
      %c0_47 = arith.constant 0 : index
      %57 = vector.load %arg16[%c0_46, %c0_47] : memref<16x32xf32, #tpu.memory_space<vmem>>, vector<16x32xf32>
      %c16_i32 = arith.constant 16 : i32
      %58 = arith.muli %c1_i32, %c16_i32 : i32
      %59 = tpu.assume_multiple %58, 16 : i32
      %60 = arith.index_cast %59 : i32 to index
      %c0_48 = arith.constant 0 : index
      %61 = vector.load %arg14[%60, %c0_48] : memref<80x128xf32, #tpu.memory_space<vmem>>, vector<16x128xf32>
      %cst_49 = arith.constant dense<0.000000e+00> : vector<16x128xf32>
      %62 = tpu.matmul %56, %7, %cst_49 {dimension_numbers = #tpu.dot_dimension_numbers<[1], [0], [0], [1], [0, 0, 1, 1], [], []>} : vector<16x32xf32>, vector<32x128xf32>, vector<16x128xf32> -> vector<16x128xf32>
      %63 = arith.addf %61, %62 : vector<16x128xf32>
      %64 = arith.addf %63, %10 : vector<16x128xf32>
      %65 = math.tanh %64 : vector<16x128xf32>
      %cst_50 = arith.constant 5.000000e-01 : f32
      %66 = vector.broadcast %cst_50 : f32 to vector<16x128xf32>
      %67 = arith.mulf %66, %65 : vector<16x128xf32>
      %cst_51 = arith.constant 5.000000e-01 : f32
      %68 = vector.broadcast %cst_51 : f32 to vector<16x128xf32>
      %69 = arith.addf %67, %68 : vector<16x128xf32>
      %70 = vector.extract_strided_slice %69 {offsets = [0, 0], sizes = [16, 32], strides = [1, 1]} : vector<16x128xf32> to vector<16x32xf32>
      %71 = vector.extract_strided_slice %69 {offsets = [0, 32], sizes = [16, 32], strides = [1, 1]} : vector<16x128xf32> to vector<16x32xf32>
      %72 = vector.extract_strided_slice %65 {offsets = [0, 64], sizes = [16, 32], strides = [1, 1]} : vector<16x128xf32> to vector<16x32xf32>
      %73 = vector.extract_strided_slice %69 {offsets = [0, 96], sizes = [16, 32], strides = [1, 1]} : vector<16x128xf32> to vector<16x32xf32>
      %74 = arith.mulf %71, %57 : vector<16x32xf32>
      %75 = arith.mulf %70, %72 : vector<16x32xf32>
      %76 = arith.addf %74, %75 : vector<16x32xf32>
      %77 = math.tanh %76 : vector<16x32xf32>
      %78 = arith.mulf %73, %77 : vector<16x32xf32>
      %79 = arith.index_cast %c1_i32 : i32 to index
      %c0_52 = arith.constant 0 : index
      %c0_53 = arith.constant 0 : index
      %80 = vector.load %arg3[%79, %c0_52, %c0_53] : memref<5x16x32xf32, #tpu.memory_space<vmem>>, vector<1x16x32xf32>
      %81 = vector.shape_cast %80 : vector<1x16x32xf32> to vector<16x32xf32>
      %cst_54 = arith.constant 0.000000e+00 : f32
      %82 = vector.broadcast %cst_54 : f32 to vector<16x32xf32>
      %83 = arith.cmpf ogt, %81, %82 : vector<16x32xf32>
      %84 = arith.select %83, %78, %56 : vector<16x32xi1>, vector<16x32xf32>
      %c0_55 = arith.constant 0 : index
      %c0_56 = arith.constant 0 : index
      %85 = vector.load %arg15[%c0_55, %c0_56] : memref<16x32xf32, #tpu.memory_space<vmem>>, vector<16x32xf32>
      tpu.vector_store %arg15[%c0_55, %c0_56], %84 {strides = array<i32>} : memref<16x32xf32, #tpu.memory_space<vmem>>, vector<16x32xf32>,
      %86 = arith.select %83, %76, %57 : vector<16x32xi1>, vector<16x32xf32>
      %c0_57 = arith.constant 0 : index
      %c0_58 = arith.constant 0 : index
      %87 = vector.load %arg16[%c0_57, %c0_58] : memref<16x32xf32, #tpu.memory_space<vmem>>, vector<16x32xf32>
      tpu.vector_store %arg16[%c0_57, %c0_58], %86 {strides = array<i32>} : memref<16x32xf32, #tpu.memory_space<vmem>>, vector<16x32xf32>,
    } else {
    }
    %c2_i32 = arith.constant 2 : i32
    %21 = arith.cmpi slt, %c2_i32, %1 : i32
    %22 = arith.extui %21 : i1 to i32
    %c0_i32_18 = arith.constant 0 : i32
    %23 = arith.cmpi ne, %22, %c0_i32_18 : i32
    scf.if %23 {
      %c0_44 = arith.constant 0 : index
      %c0_45 = arith.constant 0 : index
      %56 = vector.load %arg15[%c0_44, %c0_45] : memref<16x32xf32, #tpu.memory_space<vmem>>, vector<16x32xf32>
      %c0_46 = arith.constant 0 : index
      %c0_47 = arith.constant 0 : index
      %57 = vector.load %arg16[%c0_46, %c0_47] : memref<16x32xf32, #tpu.memory_space<vmem>>, vector<16x32xf32>
      %c16_i32 = arith.constant 16 : i32
      %58 = arith.muli %c2_i32, %c16_i32 : i32
      %59 = tpu.assume_multiple %58, 16 : i32
      %60 = arith.index_cast %59 : i32 to index
      %c0_48 = arith.constant 0 : index
      %61 = vector.load %arg14[%60, %c0_48] : memref<80x128xf32, #tpu.memory_space<vmem>>, vector<16x128xf32>
      %cst_49 = arith.constant dense<0.000000e+00> : vector<16x128xf32>
      %62 = tpu.matmul %56, %7, %cst_49 {dimension_numbers = #tpu.dot_dimension_numbers<[1], [0], [0], [1], [0, 0, 1, 1], [], []>} : vector<16x32xf32>, vector<32x128xf32>, vector<16x128xf32> -> vector<16x128xf32>
      %63 = arith.addf %61, %62 : vector<16x128xf32>
      %64 = arith.addf %63, %10 : vector<16x128xf32>
      %65 = math.tanh %64 : vector<16x128xf32>
      %cst_50 = arith.constant 5.000000e-01 : f32
      %66 = vector.broadcast %cst_50 : f32 to vector<16x128xf32>
      %67 = arith.mulf %66, %65 : vector<16x128xf32>
      %cst_51 = arith.constant 5.000000e-01 : f32
      %68 = vector.broadcast %cst_51 : f32 to vector<16x128xf32>
      %69 = arith.addf %67, %68 : vector<16x128xf32>
      %70 = vector.extract_strided_slice %69 {offsets = [0, 0], sizes = [16, 32], strides = [1, 1]} : vector<16x128xf32> to vector<16x32xf32>
      %71 = vector.extract_strided_slice %69 {offsets = [0, 32], sizes = [16, 32], strides = [1, 1]} : vector<16x128xf32> to vector<16x32xf32>
      %72 = vector.extract_strided_slice %65 {offsets = [0, 64], sizes = [16, 32], strides = [1, 1]} : vector<16x128xf32> to vector<16x32xf32>
      %73 = vector.extract_strided_slice %69 {offsets = [0, 96], sizes = [16, 32], strides = [1, 1]} : vector<16x128xf32> to vector<16x32xf32>
      %74 = arith.mulf %71, %57 : vector<16x32xf32>
      %75 = arith.mulf %70, %72 : vector<16x32xf32>
      %76 = arith.addf %74, %75 : vector<16x32xf32>
      %77 = math.tanh %76 : vector<16x32xf32>
      %78 = arith.mulf %73, %77 : vector<16x32xf32>
      %79 = arith.index_cast %c2_i32 : i32 to index
      %c0_52 = arith.constant 0 : index
      %c0_53 = arith.constant 0 : index
      %80 = vector.load %arg3[%79, %c0_52, %c0_53] : memref<5x16x32xf32, #tpu.memory_space<vmem>>, vector<1x16x32xf32>
      %81 = vector.shape_cast %80 : vector<1x16x32xf32> to vector<16x32xf32>
      %cst_54 = arith.constant 0.000000e+00 : f32
      %82 = vector.broadcast %cst_54 : f32 to vector<16x32xf32>
      %83 = arith.cmpf ogt, %81, %82 : vector<16x32xf32>
      %84 = arith.select %83, %78, %56 : vector<16x32xi1>, vector<16x32xf32>
      %c0_55 = arith.constant 0 : index
      %c0_56 = arith.constant 0 : index
      %85 = vector.load %arg15[%c0_55, %c0_56] : memref<16x32xf32, #tpu.memory_space<vmem>>, vector<16x32xf32>
      tpu.vector_store %arg15[%c0_55, %c0_56], %84 {strides = array<i32>} : memref<16x32xf32, #tpu.memory_space<vmem>>, vector<16x32xf32>,
      %86 = arith.select %83, %76, %57 : vector<16x32xi1>, vector<16x32xf32>
      %c0_57 = arith.constant 0 : index
      %c0_58 = arith.constant 0 : index
      %87 = vector.load %arg16[%c0_57, %c0_58] : memref<16x32xf32, #tpu.memory_space<vmem>>, vector<16x32xf32>
      tpu.vector_store %arg16[%c0_57, %c0_58], %86 {strides = array<i32>} : memref<16x32xf32, #tpu.memory_space<vmem>>, vector<16x32xf32>,
    } else {
    }
    %c3_i32 = arith.constant 3 : i32
    %24 = arith.cmpi slt, %c3_i32, %1 : i32
    %25 = arith.extui %24 : i1 to i32
    %c0_i32_19 = arith.constant 0 : i32
    %26 = arith.cmpi ne, %25, %c0_i32_19 : i32
    scf.if %26 {
      %c0_44 = arith.constant 0 : index
      %c0_45 = arith.constant 0 : index
      %56 = vector.load %arg15[%c0_44, %c0_45] : memref<16x32xf32, #tpu.memory_space<vmem>>, vector<16x32xf32>
      %c0_46 = arith.constant 0 : index
      %c0_47 = arith.constant 0 : index
      %57 = vector.load %arg16[%c0_46, %c0_47] : memref<16x32xf32, #tpu.memory_space<vmem>>, vector<16x32xf32>
      %c16_i32 = arith.constant 16 : i32
      %58 = arith.muli %c3_i32, %c16_i32 : i32
      %59 = tpu.assume_multiple %58, 16 : i32
      %60 = arith.index_cast %59 : i32 to index
      %c0_48 = arith.constant 0 : index
      %61 = vector.load %arg14[%60, %c0_48] : memref<80x128xf32, #tpu.memory_space<vmem>>, vector<16x128xf32>
      %cst_49 = arith.constant dense<0.000000e+00> : vector<16x128xf32>
      %62 = tpu.matmul %56, %7, %cst_49 {dimension_numbers = #tpu.dot_dimension_numbers<[1], [0], [0], [1], [0, 0, 1, 1], [], []>} : vector<16x32xf32>, vector<32x128xf32>, vector<16x128xf32> -> vector<16x128xf32>
      %63 = arith.addf %61, %62 : vector<16x128xf32>
      %64 = arith.addf %63, %10 : vector<16x128xf32>
      %65 = math.tanh %64 : vector<16x128xf32>
      %cst_50 = arith.constant 5.000000e-01 : f32
      %66 = vector.broadcast %cst_50 : f32 to vector<16x128xf32>
      %67 = arith.mulf %66, %65 : vector<16x128xf32>
      %cst_51 = arith.constant 5.000000e-01 : f32
      %68 = vector.broadcast %cst_51 : f32 to vector<16x128xf32>
      %69 = arith.addf %67, %68 : vector<16x128xf32>
      %70 = vector.extract_strided_slice %69 {offsets = [0, 0], sizes = [16, 32], strides = [1, 1]} : vector<16x128xf32> to vector<16x32xf32>
      %71 = vector.extract_strided_slice %69 {offsets = [0, 32], sizes = [16, 32], strides = [1, 1]} : vector<16x128xf32> to vector<16x32xf32>
      %72 = vector.extract_strided_slice %65 {offsets = [0, 64], sizes = [16, 32], strides = [1, 1]} : vector<16x128xf32> to vector<16x32xf32>
      %73 = vector.extract_strided_slice %69 {offsets = [0, 96], sizes = [16, 32], strides = [1, 1]} : vector<16x128xf32> to vector<16x32xf32>
      %74 = arith.mulf %71, %57 : vector<16x32xf32>
      %75 = arith.mulf %70, %72 : vector<16x32xf32>
      %76 = arith.addf %74, %75 : vector<16x32xf32>
      %77 = math.tanh %76 : vector<16x32xf32>
      %78 = arith.mulf %73, %77 : vector<16x32xf32>
      %79 = arith.index_cast %c3_i32 : i32 to index
      %c0_52 = arith.constant 0 : index
      %c0_53 = arith.constant 0 : index
      %80 = vector.load %arg3[%79, %c0_52, %c0_53] : memref<5x16x32xf32, #tpu.memory_space<vmem>>, vector<1x16x32xf32>
      %81 = vector.shape_cast %80 : vector<1x16x32xf32> to vector<16x32xf32>
      %cst_54 = arith.constant 0.000000e+00 : f32
      %82 = vector.broadcast %cst_54 : f32 to vector<16x32xf32>
      %83 = arith.cmpf ogt, %81, %82 : vector<16x32xf32>
      %84 = arith.select %83, %78, %56 : vector<16x32xi1>, vector<16x32xf32>
      %c0_55 = arith.constant 0 : index
      %c0_56 = arith.constant 0 : index
      %85 = vector.load %arg15[%c0_55, %c0_56] : memref<16x32xf32, #tpu.memory_space<vmem>>, vector<16x32xf32>
      tpu.vector_store %arg15[%c0_55, %c0_56], %84 {strides = array<i32>} : memref<16x32xf32, #tpu.memory_space<vmem>>, vector<16x32xf32>,
      %86 = arith.select %83, %76, %57 : vector<16x32xi1>, vector<16x32xf32>
      %c0_57 = arith.constant 0 : index
      %c0_58 = arith.constant 0 : index
      %87 = vector.load %arg16[%c0_57, %c0_58] : memref<16x32xf32, #tpu.memory_space<vmem>>, vector<16x32xf32>
      tpu.vector_store %arg16[%c0_57, %c0_58], %86 {strides = array<i32>} : memref<16x32xf32, #tpu.memory_space<vmem>>, vector<16x32xf32>,
    } else {
    }
    %c4_i32 = arith.constant 4 : i32
    %27 = arith.cmpi slt, %c4_i32, %1 : i32
    %28 = arith.extui %27 : i1 to i32
    %c0_i32_20 = arith.constant 0 : i32
    %29 = arith.cmpi ne, %28, %c0_i32_20 : i32
    scf.if %29 {
      %c0_44 = arith.constant 0 : index
      %c0_45 = arith.constant 0 : index
      %56 = vector.load %arg15[%c0_44, %c0_45] : memref<16x32xf32, #tpu.memory_space<vmem>>, vector<16x32xf32>
      %c0_46 = arith.constant 0 : index
      %c0_47 = arith.constant 0 : index
      %57 = vector.load %arg16[%c0_46, %c0_47] : memref<16x32xf32, #tpu.memory_space<vmem>>, vector<16x32xf32>
      %c16_i32 = arith.constant 16 : i32
      %58 = arith.muli %c4_i32, %c16_i32 : i32
      %59 = tpu.assume_multiple %58, 16 : i32
      %60 = arith.index_cast %59 : i32 to index
      %c0_48 = arith.constant 0 : index
      %61 = vector.load %arg14[%60, %c0_48] : memref<80x128xf32, #tpu.memory_space<vmem>>, vector<16x128xf32>
      %cst_49 = arith.constant dense<0.000000e+00> : vector<16x128xf32>
      %62 = tpu.matmul %56, %7, %cst_49 {dimension_numbers = #tpu.dot_dimension_numbers<[1], [0], [0], [1], [0, 0, 1, 1], [], []>} : vector<16x32xf32>, vector<32x128xf32>, vector<16x128xf32> -> vector<16x128xf32>
      %63 = arith.addf %61, %62 : vector<16x128xf32>
      %64 = arith.addf %63, %10 : vector<16x128xf32>
      %65 = math.tanh %64 : vector<16x128xf32>
      %cst_50 = arith.constant 5.000000e-01 : f32
      %66 = vector.broadcast %cst_50 : f32 to vector<16x128xf32>
      %67 = arith.mulf %66, %65 : vector<16x128xf32>
      %cst_51 = arith.constant 5.000000e-01 : f32
      %68 = vector.broadcast %cst_51 : f32 to vector<16x128xf32>
      %69 = arith.addf %67, %68 : vector<16x128xf32>
      %70 = vector.extract_strided_slice %69 {offsets = [0, 0], sizes = [16, 32], strides = [1, 1]} : vector<16x128xf32> to vector<16x32xf32>
      %71 = vector.extract_strided_slice %69 {offsets = [0, 32], sizes = [16, 32], strides = [1, 1]} : vector<16x128xf32> to vector<16x32xf32>
      %72 = vector.extract_strided_slice %65 {offsets = [0, 64], sizes = [16, 32], strides = [1, 1]} : vector<16x128xf32> to vector<16x32xf32>
      %73 = vector.extract_strided_slice %69 {offsets = [0, 96], sizes = [16, 32], strides = [1, 1]} : vector<16x128xf32> to vector<16x32xf32>
      %74 = arith.mulf %71, %57 : vector<16x32xf32>
      %75 = arith.mulf %70, %72 : vector<16x32xf32>
      %76 = arith.addf %74, %75 : vector<16x32xf32>
      %77 = math.tanh %76 : vector<16x32xf32>
      %78 = arith.mulf %73, %77 : vector<16x32xf32>
      %79 = arith.index_cast %c4_i32 : i32 to index
      %c0_52 = arith.constant 0 : index
      %c0_53 = arith.constant 0 : index
      %80 = vector.load %arg3[%79, %c0_52, %c0_53] : memref<5x16x32xf32, #tpu.memory_space<vmem>>, vector<1x16x32xf32>
      %81 = vector.shape_cast %80 : vector<1x16x32xf32> to vector<16x32xf32>
      %cst_54 = arith.constant 0.000000e+00 : f32
      %82 = vector.broadcast %cst_54 : f32 to vector<16x32xf32>
      %83 = arith.cmpf ogt, %81, %82 : vector<16x32xf32>
      %84 = arith.select %83, %78, %56 : vector<16x32xi1>, vector<16x32xf32>
      %c0_55 = arith.constant 0 : index
      %c0_56 = arith.constant 0 : index
      %85 = vector.load %arg15[%c0_55, %c0_56] : memref<16x32xf32, #tpu.memory_space<vmem>>, vector<16x32xf32>
      tpu.vector_store %arg15[%c0_55, %c0_56], %84 {strides = array<i32>} : memref<16x32xf32, #tpu.memory_space<vmem>>, vector<16x32xf32>,
      %86 = arith.select %83, %76, %57 : vector<16x32xi1>, vector<16x32xf32>
      %c0_57 = arith.constant 0 : index
      %c0_58 = arith.constant 0 : index
      %87 = vector.load %arg16[%c0_57, %c0_58] : memref<16x32xf32, #tpu.memory_space<vmem>>, vector<16x32xf32>
      tpu.vector_store %arg16[%c0_57, %c0_58], %86 {strides = array<i32>} : memref<16x32xf32, #tpu.memory_space<vmem>>, vector<16x32xf32>,
    } else {
    }
    %c5_i32 = arith.constant 5 : i32
    %c0_21 = arith.constant 0 : index
    %c0_22 = arith.constant 0 : index
    %30 = vector.load %arg15[%c0_21, %c0_22] : memref<16x32xf32, #tpu.memory_space<vmem>>, vector<16x32xf32>
    %c0_23 = arith.constant 0 : index
    %c0_24 = arith.constant 0 : index
    %31 = vector.load %arg8[%c0_23, %c0_24] : memref<32x256xf32, #tpu.memory_space<vmem>>, vector<32x256xf32>
    %cst_25 = arith.constant dense<0.000000e+00> : vector<16x256xf32>
    %32 = tpu.matmul %30, %31, %cst_25 {dimension_numbers = #tpu.dot_dimension_numbers<[1], [0], [0], [1], [0, 0, 1, 1], [], []>} : vector<16x32xf32>, vector<32x256xf32>, vector<16x256xf32> -> vector<16x256xf32>
    %c0_26 = arith.constant 0 : index
    %c0_27 = arith.constant 0 : index
    %33 = vector.load %arg4[%c0_26, %c0_27] : memref<16x384xf32, #tpu.memory_space<vmem>>, vector<16x384xf32>
    %c0_28 = arith.constant 0 : index
    %c0_29 = arith.constant 0 : index
    %34 = vector.load %arg9[%c0_28, %c0_29] : memref<384x256xf32, #tpu.memory_space<vmem>>, vector<384x256xf32>
    %cst_30 = arith.constant dense<0.000000e+00> : vector<16x256xf32>
    %35 = tpu.matmul %33, %34, %cst_30 {dimension_numbers = #tpu.dot_dimension_numbers<[1], [0], [0], [1], [0, 0, 1, 1], [], []>} : vector<16x384xf32>, vector<384x256xf32>, vector<16x256xf32> -> vector<16x256xf32>
    %36 = arith.addf %32, %35 : vector<16x256xf32>
    %c0_31 = arith.constant 0 : index
    %c0_32 = arith.constant 0 : index
    %37 = vector.load %arg10[%c0_31, %c0_32] : memref<1x256xf32, #tpu.memory_space<vmem>>, vector<1x256xf32>
    %38 = vector.broadcast %37 : vector<1x256xf32> to vector<16x256xf32>
    %39 = arith.addf %36, %38 : vector<16x256xf32>
    %cst_33 = arith.constant 0.000000e+00 : f32
    %40 = vector.broadcast %cst_33 : f32 to vector<16x256xf32>
    %41 = arith.cmpf ogt, %39, %40 : vector<16x256xf32>
    %cst_34 = arith.constant 0.00999999977 : f32
    %42 = vector.broadcast %cst_34 : f32 to vector<16x256xf32>
    %43 = arith.mulf %42, %39 : vector<16x256xf32>
    %44 = arith.select %41, %39, %43 : vector<16x256xi1>, vector<16x256xf32>
    %c0_35 = arith.constant 0 : index
    %c0_36 = arith.constant 0 : index
    %45 = vector.load %arg11[%c0_35, %c0_36] : memref<256x128xf32, #tpu.memory_space<vmem>>, vector<256x128xf32>
    %cst_37 = arith.constant dense<0.000000e+00> : vector<16x128xf32>
    %46 = tpu.matmul %44, %45, %cst_37 {dimension_numbers = #tpu.dot_dimension_numbers<[1], [0], [0], [1], [0, 0, 1, 1], [], []>} : vector<16x256xf32>, vector<256x128xf32>, vector<16x128xf32> -> vector<16x128xf32>
    %c0_38 = arith.constant 0 : index
    %c0_39 = arith.constant 0 : index
    %47 = vector.load %arg12[%c0_38, %c0_39] : memref<1x128xf32, #tpu.memory_space<vmem>>, vector<1x128xf32>
    %48 = vector.broadcast %47 : vector<1x128xf32> to vector<16x128xf32>
    %49 = arith.addf %46, %48 : vector<16x128xf32>
    %cst_40 = arith.constant 0.000000e+00 : f32
    %50 = vector.broadcast %cst_40 : f32 to vector<16x128xf32>
    %51 = arith.cmpf ogt, %49, %50 : vector<16x128xf32>
    %cst_41 = arith.constant 0.00999999977 : f32
    %52 = vector.broadcast %cst_41 : f32 to vector<16x128xf32>
    %53 = arith.mulf %52, %49 : vector<16x128xf32>
    %54 = arith.select %51, %49, %53 : vector<16x128xi1>, vector<16x128xf32>
    %c0_42 = arith.constant 0 : index
    %c0_43 = arith.constant 0 : index
    %55 = vector.load %arg13[%c0_42, %c0_43] : memref<16x128xf32, #tpu.memory_space<vmem>>, vector<16x128xf32>
    tpu.vector_store %arg13[%c0_42, %c0_43], %54 {strides = array<i32>} : memref<16x128xf32, #tpu.memory_space<vmem>>, vector<16x128xf32>,
    return
  }
  func.func @transform_0(%arg0: i32, %arg1: memref<1xi32, #tpu.memory_space<smem>>) -> (i32, i32, i32) {
    %c0_i32 = arith.constant 0 : i32
    %c0_i32_0 = arith.constant 0 : i32
    %c0_i32_1 = arith.constant 0 : i32
    return %c0_i32, %arg0, %c0_i32_0 : i32, i32, i32
  }
  func.func @transform_1(%arg0: i32, %arg1: memref<1xi32, #tpu.memory_space<smem>>) -> (i32, i32, i32) {
    %c0_i32 = arith.constant 0 : i32
    %c0_i32_0 = arith.constant 0 : i32
    %c0_i32_1 = arith.constant 0 : i32
    return %c0_i32, %arg0, %c0_i32_0 : i32, i32, i32
  }
  func.func @transform_2(%arg0: i32, %arg1: memref<1xi32, #tpu.memory_space<smem>>) -> (i32, i32) {
    %c0_i32 = arith.constant 0 : i32
    %c0_i32_0 = arith.constant 0 : i32
    return %arg0, %c0_i32 : i32, i32
  }
  func.func @transform_3(%arg0: i32, %arg1: memref<1xi32, #tpu.memory_space<smem>>) -> (i32, i32) {
    %c0_i32 = arith.constant 0 : i32
    %c0_i32_0 = arith.constant 0 : i32
    %c0_i32_1 = arith.constant 0 : i32
    return %c0_i32, %c0_i32_0 : i32, i32
  }
  func.func @transform_4(%arg0: i32, %arg1: memref<1xi32, #tpu.memory_space<smem>>) -> (i32, i32) {
    %c0_i32 = arith.constant 0 : i32
    %c0_i32_0 = arith.constant 0 : i32
    %c0_i32_1 = arith.constant 0 : i32
    return %c0_i32, %c0_i32_0 : i32, i32
  }
  func.func @transform_5(%arg0: i32, %arg1: memref<1xi32, #tpu.memory_space<smem>>) -> (i32, i32) {
    %c0_i32 = arith.constant 0 : i32
    %c0_i32_0 = arith.constant 0 : i32
    %c0_i32_1 = arith.constant 0 : i32
    return %c0_i32, %c0_i32_0 : i32, i32
  }
  func.func @transform_6(%arg0: i32, %arg1: memref<1xi32, #tpu.memory_space<smem>>) -> (i32, i32) {
    %c0_i32 = arith.constant 0 : i32
    %c0_i32_0 = arith.constant 0 : i32
    %c0_i32_1 = arith.constant 0 : i32
    return %c0_i32, %c0_i32_0 : i32, i32
  }
  func.func @transform_7(%arg0: i32, %arg1: memref<1xi32, #tpu.memory_space<smem>>) -> (i32, i32) {
    %c0_i32 = arith.constant 0 : i32
    %c0_i32_0 = arith.constant 0 : i32
    %c0_i32_1 = arith.constant 0 : i32
    return %c0_i32, %c0_i32_0 : i32, i32
  }
  func.func @transform_8(%arg0: i32, %arg1: memref<1xi32, #tpu.memory_space<smem>>) -> (i32, i32) {
    %c0_i32 = arith.constant 0 : i32
    %c0_i32_0 = arith.constant 0 : i32
    %c0_i32_1 = arith.constant 0 : i32
    return %c0_i32, %c0_i32_0 : i32, i32
  }
  func.func @transform_9(%arg0: i32, %arg1: memref<1xi32, #tpu.memory_space<smem>>) -> (i32, i32) {
    %c0_i32 = arith.constant 0 : i32
    %c0_i32_0 = arith.constant 0 : i32
    %c0_i32_1 = arith.constant 0 : i32
    return %c0_i32, %c0_i32_0 : i32, i32
  }
  func.func @transform_10(%arg0: i32, %arg1: memref<1xi32, #tpu.memory_space<smem>>) -> (i32, i32) {
    %c0_i32 = arith.constant 0 : i32
    %c0_i32_0 = arith.constant 0 : i32
    %c0_i32_1 = arith.constant 0 : i32
    return %c0_i32, %c0_i32_0 : i32, i32
  }
  func.func @transform_11(%arg0: i32, %arg1: memref<1xi32, #tpu.memory_space<smem>>) -> (i32, i32) {
    %c0_i32 = arith.constant 0 : i32
    %c0_i32_0 = arith.constant 0 : i32
    return %arg0, %c0_i32 : i32, i32
  }
}

</mosaic_0001>

<bundles_post_ra>
// kernel: tpu_custom_call.1
= control target key start
LH: loop header
LB: loop body
LE: loop exit
PB: predicated region body
PF: predicated region fallthrough
CT: control target
= control target key end

     0   :  { %18 = vsyncpa [#allocation8], 0  ;;  %s2915_s0 = inlined_call_operand.<no memory space> [shape: s32[1], index: 0, kind: input, shape index: {}]   ;;  %s2916_s1 = inlined_call_operand.hbm [shape: bf16[5,16,176], index: 1, kind: input, shape index: {}]   ;;  %s2917_s2 = inlined_call_operand.hbm [shape: f32[5,16,32], index: 2, kind: input, shape index: {}]   ;;  %s2918_s3 = inlined_call_operand.hbm [shape: f32[16,384], index: 3, kind: input, shape index: {}]   ;;  %s2919_s4 = inlined_call_operand.hbm [shape: bf16[176,128], index: 4, kind: input, shape index: {}]   ;;  %s2920_s5 = inlined_call_operand.hbm [shape: f32[32,128], index: 5, kind: input, shape index: {}]   ;;  %s2921_s6 = inlined_call_operand.vmem [shape: f32[1,128], index: 6, kind: input, shape index: {}]   ;;  %s2922_s7 = inlined_call_operand.hbm [shape: f32[32,256], index: 7, kind: input, shape index: {}]   ;;  %s2923_s8 = inlined_call_operand.hbm [shape: f32[384,256], index: 8, kind: input, shape index: {}]   ;;  %s2924_s9 = inlined_call_operand.vmem [shape: f32[1,256], index: 9, kind: input, shape index: {}]   ;;  %s2925_s10 = inlined_call_operand.hbm [shape: f32[256,128], index: 10, kind: input, shape index: {}]   ;;  %s2926_s11 = inlined_call_operand.vmem [shape: f32[1,128], index: 11, kind: input, shape index: {}]   ;;  %s2927_s12 = inlined_call_operand.hbm [shape: f32[16,128], index: 12, kind: output, shape index: {}]  }
   0x1   :  { %19 = vsyncpa [#allocation11], 0 }
   0x2   :  { %20 = vsyncpa [#allocation14], 0 }
   0x3   :  { %21 = vsyncpa [#allocation17], 0 }
   0x4   :  { %22 = vsyncpa [#allocation20], 0 }
   0x5   :  { %23 = vsyncpa [#allocation9], 0  ;;  %s2477_s21 = smov [#allocation10]   ;;  %s2478_s23 = smov [#allocation13]  }
   0x6   :  { %s41_s22 = sshll.u32 %s2477_s21, 4  ;;  %s65_s24 = sshll.u32 %s2478_s23, 4  ;;  %s42_s22 = int_to_ptr.vmem [resolvable:$true] %s41_s22  ;;  %s2576_s24 = int_to_ptr.vmem [resolvable:$true] %s65_s24 }
   0x7   :  { %s2267_s27 = scalar_lea.hbm %s2917_s2, 1280 }
   0x8   :  { %p2268_p0 = scmp.ne.s32.totalorder %s2917_s2, %s2267_s27  ;;  %p2271_p1 = scmp.lt.u32.totalorder %s2267_s27, %s2917_s2 }
   0xa   :  { %p2273_p2 = pnand %p2271_p1, %p2268_p0 }
   0xc   :  { %2276 = shalt.err (!%p2273_p2)
}
   0xd   :  { %s2277_s14 = scalar_lea.vmem %s42_s22, 1280  ;;  %p2282_p4 = scmp.lt.s32.totalorder %s42_s22, %s42_s22 }
   0xe   :  { %p2278_p3 = scmp.ne.s32.totalorder %s42_s22, %s2277_s14  ;;  %p2283_p5 = scmp.lt.s32.totalorder %s2277_s14, %s2277_s14 }
  0x10   :  { %p2284_p6 = por %p2283_p5, %p2282_p4 }
  0x12   :  { %p2285_p7 = pnand %p2284_p6, %p2278_p3 }
  0x14   :  { %2288 = shalt.err (!%p2285_p7)
}
  0x15   :  { %s2479_s15 = smov 128   ;;  %s2480_s16 = smov 8  }
  0x16   :  { %47 = dma.hbm_to_vmem [thread:$0]  %s2917_s2, 1280, %s42_s22, [#allocation11], %s2479_s15, %s2479_s15, %s2480_s16  }
  0x17   :  { %s2289_s21 = scalar_lea.hbm %s2919_s4, 1408 }
  0x18   :  { %p2290_p8 = scmp.ne.s32.totalorder %s2919_s4, %s2289_s21  ;;  %p2293_p9 = scmp.lt.u32.totalorder %s2289_s21, %s2919_s4 }
  0x1a   :  { %p2295_p10 = pnand %p2293_p9, %p2290_p8 }
  0x1c   :  { %2298 = shalt.err (!%p2295_p10)
}
  0x1d   :  { %s2299_s28 = scalar_lea.vmem %s2576_s24, 1408  ;;  %p2304_p12 = scmp.lt.s32.totalorder %s2576_s24, %s2576_s24 }
  0x1e   :  { %p2300_p11 = scmp.ne.s32.totalorder %s2576_s24, %s2299_s28  ;;  %p2305_p13 = scmp.lt.s32.totalorder %s2299_s28, %s2299_s28 }
  0x20   :  { %p2306_p0 = por %p2305_p13, %p2304_p12 }
  0x22   :  { %p2307_p1 = pnand %p2306_p0, %p2300_p11 }
  0x24   :  { %2310 = shalt.err (!%p2307_p1)
}
  0x25   :  { %s2481_s2 = smov 64   ;;  %s2482_s22 = smov 4  }
  0x26   :  { %71 = dma.hbm_to_vmem [thread:$0]  %s2919_s4, 1408, %s2576_s24, [#allocation14], %s2481_s2, %s2481_s2, %s2482_s22  }
  0x27   :  { %s2483_s13 = smov [#allocation16]   ;;  %s2311_s19 = scalar_lea.hbm %s2922_s7, 1024 }
  0x28   :  { %s91_s14 = sshll.u32 %s2483_s13, 4  ;;  %p2312_p2 = scmp.ne.s32.totalorder %s2922_s7, %s2311_s19  ;;  %s92_s14 = int_to_ptr.vmem [resolvable:$true] %s91_s14 }
  0x29   :  { %p2315_p3 = scmp.lt.u32.totalorder %s2311_s19, %s2922_s7 }
  0x2b   :  { %p2317_p4 = pnand %p2315_p3, %p2312_p2 }
  0x2d   :  { %2320 = shalt.err (!%p2317_p4)
}
  0x2e   :  { %s2321_s26 = scalar_lea.vmem %s92_s14, 1024  ;;  %p2326_p6 = scmp.lt.s32.totalorder %s92_s14, %s92_s14 }
  0x2f   :  { %p2322_p5 = scmp.ne.s32.totalorder %s92_s14, %s2321_s26  ;;  %p2327_p7 = scmp.lt.s32.totalorder %s2321_s26, %s2321_s26 }
  0x31   :  { %p2328_p8 = por %p2327_p7, %p2326_p6 }
  0x33   :  { %p2329_p9 = pnand %p2328_p8, %p2322_p5 }
  0x35   :  { %2332 = shalt.err (!%p2329_p9)
}
  0x36   :  { %s2484_s4 = smov 256   ;;  %s2485_s24 = smov 16  }
  0x37   :  { %97 = dma.hbm_to_vmem [thread:$0]  %s2922_s7, 1024, %s92_s14, [#allocation17], %s2484_s4, %s2484_s4, %s2485_s24  }
  0x38   :  { %s2486_s2 = smov [#allocation7]   ;;  %s2487_s29 = smov [#allocation12]  }
  0x39   :  { %s29_s22 = sshll.u32 %s2486_s2, 4  ;;  %s53_s30 = sshll.u32 %s2487_s29, 4  ;;  %s30_s22 = int_to_ptr.vmem [resolvable:$true] %s29_s22  ;;  %s54_s30 = int_to_ptr.vmem [resolvable:$true] %s53_s30 }
  0x3a   :  { %s2333_s18 = scalar_lea.hbm %s2916_s1, 1280 }
  0x3b   :  { %p2334_p10 = scmp.ne.s32.totalorder %s2916_s1, %s2333_s18  ;;  %p2337_p11 = scmp.lt.u32.totalorder %s2333_s18, %s2916_s1 }
  0x3d   :  { %p2339_p12 = pnand %p2337_p11, %p2334_p10 }
  0x3f   :  { %2342 = shalt.err (!%p2339_p12)
}
  0x40   :  { %s2343_s7 = scalar_lea.vmem %s30_s22, 1280  ;;  %p2348_p0 = scmp.lt.s32.totalorder %s30_s22, %s30_s22 }
  0x41   :  { %p2344_p13 = scmp.ne.s32.totalorder %s30_s22, %s2343_s7  ;;  %p2349_p1 = scmp.lt.s32.totalorder %s2343_s7, %s2343_s7 }
  0x43   :  { %p2350_p2 = por %p2349_p1, %p2348_p0 }
  0x45   :  { %p2351_p3 = pnand %p2350_p2, %p2344_p13 }
  0x47   :  { %2354 = shalt.err (!%p2351_p3)
}
  0x48   :  { %35 = dma.hbm_to_vmem [thread:$0]  %s2916_s1, 1280, %s30_s22, [#allocation8], %s2479_s15, %s2479_s15, %s2480_s16  }
  0x49   :  { %s2355_s28 = scalar_lea.hbm %s2918_s3, 768 }
  0x4a   :  { %p2356_p4 = scmp.ne.s32.totalorder %s2918_s3, %s2355_s28  ;;  %p2359_p5 = scmp.lt.u32.totalorder %s2355_s28, %s2918_s3 }
  0x4c   :  { %p2361_p6 = pnand %p2359_p5, %p2356_p4 }
  0x4e   :  { %2364 = shalt.err (!%p2361_p6)
}
  0x4f   :  { %s2365_s18 = scalar_lea.vmem %s54_s30, 768  ;;  %p2370_p8 = scmp.lt.s32.totalorder %s54_s30, %s54_s30 }
  0x50   :  { %p2366_p7 = scmp.ne.s32.totalorder %s54_s30, %s2365_s18  ;;  %p2371_p9 = scmp.lt.s32.totalorder %s2365_s18, %s2365_s18 }
  0x52   :  { %p2372_p10 = por %p2371_p9, %p2370_p8 }
  0x54   :  { %p2373_p11 = pnand %p2372_p10, %p2366_p7 }
  0x56   :  { %2376 = shalt.err (!%p2373_p11)
}
  0x57   :  { %s2488_s1 = smov 384   ;;  %s2489_s22 = smov 24  }
  0x58   :  { %59 = dma.hbm_to_vmem [thread:$0]  %s2918_s3, 768, %s54_s30, [#allocation11], %s2488_s1, %s2488_s1, %s2489_s22  }
  0x59   :  { %s2490_s21 = smov [#allocation15]   ;;  %s2491_s7 = smov [#allocation18]  }
  0x5a   :  { %s77_s23 = sshll.u32 %s2490_s21, 4  ;;  %s103_s14 = sshll.u32 %s2491_s7, 4  ;;  %s78_s23 = int_to_ptr.vmem [resolvable:$true] %s77_s23  ;;  %s104_s14 = int_to_ptr.vmem [resolvable:$true] %s103_s14 }
  0x5b   :  { %s2377_s27 = scalar_lea.hbm %s2920_s5, 512 }
  0x5c   :  { %p2378_p12 = scmp.ne.s32.totalorder %s2920_s5, %s2377_s27  ;;  %p2381_p13 = scmp.lt.u32.totalorder %s2377_s27, %s2920_s5 }
  0x5e   :  { %p2383_p0 = pnand %p2381_p13, %p2378_p12 }
  0x60   :  { %2386 = shalt.err (!%p2383_p0)
}
  0x61   :  { %s2387_s3 = scalar_lea.vmem %s78_s23, 512  ;;  %p2392_p2 = scmp.lt.s32.totalorder %s78_s23, %s78_s23 }
  0x62   :  { %p2388_p1 = scmp.ne.s32.totalorder %s78_s23, %s2387_s3  ;;  %p2393_p3 = scmp.lt.s32.totalorder %s2387_s3, %s2387_s3 }
  0x64   :  { %p2394_p4 = por %p2393_p3, %p2392_p2 }
  0x66   :  { %p2395_p5 = pnand %p2394_p4, %p2388_p1 }
  0x68   :  { %2398 = shalt.err (!%p2395_p5)
}
  0x69   :  { %83 = dma.hbm_to_vmem [thread:$0]  %s2920_s5, 512, %s78_s23, [#allocation14], %s2479_s15, %s2479_s15, %s2480_s16  }
  0x6a   :  { %s2399_s22 = scalar_lea.hbm %s2923_s8, 12288 }
  0x6b   :  { %p2400_p6 = scmp.ne.s32.totalorder %s2923_s8, %s2399_s22  ;;  %p2403_p7 = scmp.lt.u32.totalorder %s2399_s22, %s2923_s8 }
  0x6d   :  { %p2405_p8 = pnand %p2403_p7, %p2400_p6 }
  0x6f   :  { %2408 = shalt.err (!%p2405_p8)
}
  0x70   :  { %s2409_s25 = scalar_lea.vmem %s104_s14, 12288  ;;  %p2414_p10 = scmp.lt.s32.totalorder %s104_s14, %s104_s14 }
  0x71   :  { %p2410_p9 = scmp.ne.s32.totalorder %s104_s14, %s2409_s25  ;;  %p2415_p11 = scmp.lt.s32.totalorder %s2409_s25, %s2409_s25 }
  0x73   :  { %p2416_p12 = por %p2415_p11, %p2414_p10 }
  0x75   :  { %p2417_p13 = pnand %p2416_p12, %p2410_p9 }
  0x77   :  { %2420 = shalt.err (!%p2417_p13)
}
  0x78   :  { %109 = dma.hbm_to_vmem [thread:$0]  %s2923_s8, 12288, %s104_s14, [#allocation17], %s2484_s4, %s2484_s4, %s2485_s24  }
  0x79   :  { %s2492_s26 = smov [#allocation19]   ;;  %s2421_s29 = scalar_lea.hbm %s2925_s10, 4096 }
  0x7a   :  { %s117_s27 = sshll.u32 %s2492_s26, 4  ;;  %p2422_p0 = scmp.ne.s32.totalorder %s2925_s10, %s2421_s29  ;;  %s118_s27 = int_to_ptr.vmem [resolvable:$true] %s117_s27 }
  0x7b   :  { %p2425_p1 = scmp.lt.u32.totalorder %s2421_s29, %s2925_s10 }
  0x7d   :  { %p2427_p2 = pnand %p2425_p1, %p2422_p0 }
  0x7f   :  { %2430 = shalt.err (!%p2427_p2)
}
  0x80   :  { %s2431_s18 = scalar_lea.vmem %s118_s27, 4096  ;;  %p2436_p4 = scmp.lt.s32.totalorder %s118_s27, %s118_s27 }
  0x81   :  { %p2432_p3 = scmp.ne.s32.totalorder %s118_s27, %s2431_s18  ;;  %p2437_p5 = scmp.lt.s32.totalorder %s2431_s18, %s2431_s18 }
  0x83   :  { %p2438_p6 = por %p2437_p5, %p2436_p4 }
  0x85   :  { %p2439_p7 = pnand %p2438_p6, %p2432_p3 }
  0x87   :  { %2442 = shalt.err (!%p2439_p7)
}
  0x88   :  { %123 = dma.hbm_to_vmem [thread:$0]  %s2925_s10, 4096, %s118_s27, [#allocation20], %s2479_s15, %s2479_s15, %s2480_s16  }
  0x89   :  { %2465 = dma.done.wait [#allocation8], 1280  }
  0x8a   :  { %2466 = vsyncadd [#allocation8], 4294966016 }
  0x8b   :  { %2467 = dma.done.wait [#allocation11], 2048  }
  0x8c   :  { %2468 = vsyncadd [#allocation11], 4294965248 }
  0x8d   :  { %2469 = dma.done.wait [#allocation14], 1920  }
  0x8e   :  { %2470 = vsyncadd [#allocation14], 4294965376 }
  0x8f   :  { %2471 = dma.done.wait [#allocation17], 13312  }
  0x90   :  { %2472 = vsyncadd [#allocation17], 4294953984 }
  0x91   :  { %2473 = dma.done.wait [#allocation20], 4096  }
  0x92   :  { %2474 = vsyncadd [#allocation20], 4294963200  ;;  %vm405_vm0 = vcmask 261120   ;;  %v2493_v0 = vmov 0.0   ;;  %v2494_v1 = vmov 0   ;;  %v2705_v2 = vld [vmem:[#allocation15] sm:$0xff] }
  0x93   :  { %406 = vst.msk [vmem:[#allocation3] sm:$0xff] %vm405_vm0, %v2493_v0  ;;  %407 = vst.msk [vmem:[#allocation3 + $0x8] sm:$0xff] %vm405_vm0, %v2493_v0  ;;  %311 = vmatprep.subr.bf16.mxu0 %v2494_v1  ;;  %2137 = vmatprep.subr.bf16.mxu1 %v2494_v1  ;;  %v2707_v3 = vld [vmem:[#allocation15 + $0x8] sm:$0xff]  ;;  %v2709_v4 = vld [vmem:[#allocation15 + $0x10] sm:$0xff]  ;;  %vm295_vm1 = vcmask 392192   ;;  %p1820_p8 = scmp.le.s32.totalorder %s2915_s0, 0 }
  0x94   :  { %408 = vst.msk [vmem:[#allocation4] sm:$0xff] %vm405_vm0, %v2493_v0  ;;  %409 = vst.msk [vmem:[#allocation4 + $0x8] sm:$0xff] %vm405_vm0, %v2493_v0  ;;  %v2711_v5 = vld [vmem:[#allocation15 + $0x18] sm:$0xff]  ;;  %v2716_v6 = vld [vmem:[%s2921_s6] ss:$0 sm:$0xff]  ;;  %v1961_v48 = vpack.c.bf16 (!%p1820_p8), %v2707_v3, %v2705_v2  ;;  %s2495_s1 = smov (!%p1820_p8), 32  }
  0x95   :  { %v2201_v7 = vld [vmem:[#allocation13] sm:$0xff]   ;;  %v2202_v8 = vld [vmem:[#allocation13 + $0x8] sm:$0xff]   ;;  %v2203_v9 = vld [vmem:[#allocation13 + $0x10] sm:$0xff]   ;;  %v1965_v49 = vpack.c.bf16 (!%p1820_p8), %v2711_v5, %v2709_v4  ;;  %s2496_s22 = smov (!%p1820_p8), 64   ;;  %s2497_s19 = smov (!%p1820_p8), 96  }
  0x96   :  { %312 = vmatpush1.bf16.msra.mxu0 %v2201_v7  ;;  %2148 = vmatpush1.bf16.msra.mxu1 %v2201_v7  ;;  %v2204_v10 = vld [vmem:[#allocation13 + $0x18] sm:$0xff]   ;;  %v2217_v12 = vld [vmem:[#allocation7 + $0x34] ss:$8 sps:$4 sm:$0xff]   ;;  %v2207_v15 = vld [vmem:[#allocation13 + $0x30] sm:$0xff]  }
  0x97   :  { %313 = vmatprep.subr.bf16.mxu0 %v2494_v1  ;;  %2138 = vmatprep.subr.bf16.mxu1 %v2494_v1  ;;  %v2214_v11 = vld [vmem:[#allocation7 + $0x4] ss:$8 sps:$4 sm:$0xff]   ;;  %v2205_v13 = vld [vmem:[#allocation13 + $0x20] sm:$0xff]   ;;  %v2206_v14 = vld [vmem:[#allocation13 + $0x28] sm:$0xff]  }
  0x98   :  { %1814 = vmatprep.mubr.msk.bf16.mxu0 %vm295_vm1, %v2214_v11  ;;  %1817 = vmatprep.mubr.msk.bf16.mxu1 %vm295_vm1, %v2217_v12  ;;  %v2208_v16 = vld [vmem:[#allocation13 + $0x38] sm:$0xff]   ;;  %v2209_v17 = vld [vmem:[#allocation13 + $0x40] sm:$0xff]   ;;  %v2210_v18 = vld [vmem:[#allocation13 + $0x48] sm:$0xff]  }
  0x99   :  { %v2211_v19 = vld [vmem:[#allocation13 + $0x50] sm:$0xff]   ;;  %v2215_v21 = vld [vmem:[#allocation7 + $0x30] ss:$8 sps:$4 sm:$0xff]   ;;  %v2218_v22 = vld [vmem:[#allocation7 + $0x14] ss:$8 sps:$4 sm:$0xff]  }
  0x9a   :  { %314 = vmatpush1.bf16.msra.mxu0 %v2202_v8  ;;  %2149 = vmatpush1.bf16.msra.mxu1 %v2202_v8  ;;  %v2212_v20 = vld [vmem:[#allocation7] ss:$8 sps:$4 sm:$0xff]   ;;  %v2221_v23 = vld [vmem:[#allocation7 + $0x44] ss:$8 sps:$4 sm:$0xff]   ;;  %v2220_v24 = vld [vmem:[#allocation7 + $0x10] ss:$8 sps:$4 sm:$0xff]  }
  0x9b   :  { %315 = vmatprep.subr.bf16.mxu0 %v2494_v1  ;;  %2139 = vmatprep.subr.bf16.mxu1 %v2494_v1  ;;  %v2223_v25 = vld [vmem:[#allocation7 + $0x40] ss:$8 sps:$4 sm:$0xff]   ;;  %v2224_v26 = vld [vmem:[#allocation7 + $0x24] ss:$8 sps:$4 sm:$0xff]   ;;  %v2732_v51 = vld [vmem:[#allocation4] sm:$0xff] (!%p1820_p8) }
  0x9c   :  { %v2226_v27 = vld [vmem:[#allocation7 + $0x20] ss:$8 sps:$4 sm:$0xff]   ;;  %513 = vrot.lane.b32.xlu1 (!%p1820_p8), %v2732_v51, %s2495_s1  ;;  %v2738_v52 = vld [vmem:[#allocation4 + $0x8] sm:$0xff] (!%p1820_p8) }
  0x9d   :  { %v2730_v50 = vld [vmem:[#allocation3] sm:$0xff] (!%p1820_p8)  ;;  %v415_v53 = vld [vmem:[#allocation3 + $0x8] sm:$0xff] (!%p1820_p8) }
  0x9e   :  { %316 = vmatpush1.bf16.msra.mxu0 %v2203_v9  ;;  %2150 = vmatpush1.bf16.msra.mxu1 %v2203_v9 }
  0x9f   :  { %317 = vmatprep.subr.bf16.mxu0 %v2494_v1  ;;  %2140 = vmatprep.subr.bf16.mxu1 %v2494_v1 }
  0xa0   :  { %515 = vrot.lane.b32.xlu1 (!%p1820_p8), %v2738_v52, %s2495_s1 }
  0xa2   :  { %318 = vmatpush1.bf16.msra.mxu0 %v2204_v10  ;;  %2151 = vmatpush1.bf16.msra.mxu1 %v2204_v10 }
  0xa3   :  { %319 = vmatprep.subr.bf16.mxu0 %v2494_v1  ;;  %2141 = vmatprep.subr.bf16.mxu1 %v2494_v1 }
  0xa6   :  { %320 = vmatpush1.bf16.msra.mxu0 %v2205_v13  ;;  %2152 = vmatpush1.bf16.msra.mxu1 %v2205_v13 }
  0xa7   :  { %321 = vmatprep.subr.bf16.mxu0 %v2494_v1  ;;  %2142 = vmatprep.subr.bf16.mxu1 %v2494_v1 }
  0xaa   :  { %322 = vmatpush1.bf16.msra.mxu0 %v2206_v14  ;;  %2153 = vmatpush1.bf16.msra.mxu1 %v2206_v14 }
  0xab   :  { %323 = vmatprep.subr.bf16.mxu0 %v2494_v1  ;;  %2143 = vmatprep.subr.bf16.mxu1 %v2494_v1 }
  0xae   :  { %324 = vmatpush1.bf16.msra.mxu0 %v2207_v15  ;;  %2154 = vmatpush1.bf16.msra.mxu1 %v2207_v15 }
  0xaf   :  { %325 = vmatprep.subr.bf16.mxu0 %v2494_v1  ;;  %2144 = vmatprep.subr.bf16.mxu1 %v2494_v1 }
  0xb2   :  { %326 = vmatpush1.bf16.msra.mxu0 %v2208_v16  ;;  %2155 = vmatpush1.bf16.msra.mxu1 %v2208_v16 }
  0xb3   :  { %327 = vmatprep.subr.bf16.mxu0 %v2494_v1  ;;  %2145 = vmatprep.subr.bf16.mxu1 %v2494_v1 }
  0xb6   :  { %328 = vmatpush1.bf16.msra.mxu0 %v2209_v17  ;;  %2156 = vmatpush1.bf16.msra.mxu1 %v2209_v17 }
  0xb7   :  { %329 = vmatprep.subr.bf16.mxu0 %v2494_v1  ;;  %2146 = vmatprep.subr.bf16.mxu1 %v2494_v1 }
  0xba   :  { %330 = vmatpush1.bf16.msra.mxu0 %v2210_v18  ;;  %2157 = vmatpush1.bf16.msra.mxu1 %v2210_v18 }
  0xbb   :  { %331 = vmatprep.subr.bf16.mxu0 %v2494_v1  ;;  %2147 = vmatprep.subr.bf16.mxu1 %v2494_v1 }
  0xbe   :  { %332 = vmatpush1.bf16.msra.mxu0 %v2211_v19  ;;  %2158 = vmatpush1.bf16.msra.mxu1 %v2211_v19 }
  0xbf   :  { %1962 = vmatprep.subr.bf16.mxu0 (!%p1820_p8), %v1961_v48 }
  0xc1   :  { %344 = vmatmul.mubr.bf16.vlgmr.msra.gmra.mrb[0].mxu0 %v2212_v20  ;;  %368 = vmatmul.mubr.bf16.vlgmr.msra.gmra.mrb[0].mxu1 %v2215_v21 }
  0xc2   :  { %1815 = vmatprep.mubr.msk.bf16.mxu0 %vm295_vm1, %v2218_v22  ;;  %1818 = vmatprep.mubr.msk.bf16.mxu1 %vm295_vm1, %v2221_v23 }
  0xc3   :  { %1964 = vmatpush3.bf16.msra.mxu0 (!%p1820_p8), %v1961_v48 }
  0xc4   :  { %1966 = vmatprep.subr.bf16.mxu0 (!%p1820_p8), %v1965_v49 }
  0xc7   :  { %1968 = vmatpush3.bf16.msra.mxu0 (!%p1820_p8), %v1965_v49 }
  0xc9   :  { %352 = vmatmul.mubr.bf16.gmra.mrb[4].mxu0 %v2220_v24  ;;  %376 = vmatmul.mubr.bf16.gmra.mrb[4].mxu1 %v2223_v25 }
  0xca   :  { %1816 = vmatprep.mubr.msk.bf16.mxu0 %vm295_vm1, %v2224_v26 }
  0xd1   :  { %360 = vmatmul.mubr.bf16.gmra.mrb[8].mxu0 %v2226_v27 }
  0xd2   :  { %1914 = vmatprep.mubr.msk.f32.mxu0 (!%p1820_p8), %vm405_vm0, %v2730_v50 }
 0x10e   :  { %v514_v14 = vpop.permute.xlu1 (!%p1820_p8), %513 }
 0x112   :  { %v516_v16 = vpop.permute.xlu1 (!%p1820_p8), %515 }
 0x194   :  { %v345_v28 = vpop.f32.mrb[0].mxu0  ;;  %v369_v29 = vpop.f32.mrb[0].mxu1 }
 0x195   :  { %384 = vst [vmem:[#allocation2] sm:$0xff] %v345_v28  ;;  %v347_v30 = vpop.f32.mrb[1].mxu0  ;;  %390 = vst [vmem:[#allocation2 + $0x30] sm:$0xff] %v369_v29  ;;  %v371_v31 = vpop.f32.mrb[1].mxu1  ;;  %1915 = vmatmul.mubr.msk.f32.vlgmr.msra.gmra.mrb[0].mxu0 (!%p1820_p8), %vm405_vm0, %v415_v53  ;;  %v553_v28 = vld [vmem:[#allocation10] sm:$0xff] (!%p1820_p8)  ;;  %v554_v29 = vld [vmem:[#allocation10 + $0x8] sm:$0xff] (!%p1820_p8) }
 0x196   :  { %v348_v32 = vpop.f32.mrb[2].mxu0  ;;  %v372_v33 = vpop.f32.mrb[2].mxu1  ;;  %vm555_vm2 = vcmp.gt.f32.partialorder (!%p1820_p8), %v553_v28, 0.0  ;;  %vm556_vm3 = vcmp.gt.f32.partialorder (!%p1820_p8), %v554_v29, 0.0 }
 0x197   :  { %385 = vst [vmem:[#allocation2 + $0x8] sm:$0xff] %v348_v32  ;;  %v350_v34 = vpop.f32.mrb[3].mxu0  ;;  %391 = vst [vmem:[#allocation2 + $0x38] sm:$0xff] %v372_v33  ;;  %v374_v35 = vpop.f32.mrb[3].mxu1 }
 0x19c   :  { %v353_v36 = vpop.f32.mrb[4].mxu0  ;;  %v377_v37 = vpop.f32.mrb[4].mxu1  ;;  %v418_v55 = vld [vmem:[#allocation2] sm:$0xff] (!%p1820_p8) }
 0x19d   :  { %386 = vst [vmem:[#allocation2 + $0x10] sm:$0xff] %v353_v36  ;;  %v355_v38 = vpop.f32.mrb[5].mxu0  ;;  %392 = vst [vmem:[#allocation2 + $0x40] sm:$0xff] %v377_v37  ;;  %v379_v39 = vpop.f32.mrb[5].mxu1 }
 0x19e   :  { %v356_v40 = vpop.f32.mrb[6].mxu0  ;;  %v380_v41 = vpop.f32.mrb[6].mxu1  ;;  %v419_v54 = vld [vmem:[#allocation2 + $0x8] sm:$0xff] (!%p1820_p8) }
 0x19f   :  { %387 = vst [vmem:[#allocation2 + $0x18] sm:$0xff] %v356_v40  ;;  %v358_v42 = vpop.f32.mrb[7].mxu0  ;;  %393 = vst [vmem:[#allocation2 + $0x48] sm:$0xff] %v380_v41  ;;  %v382_v43 = vpop.f32.mrb[7].mxu1 }
 0x1a1   :  { %413 = sbr.rel (%p1820_p8) target bundleno = 1120 (0x460), region = 81 }
 0x1a4   :  { %v361_v44 = vpop.f32.mrb[8].mxu0 }
 0x1a5   :  { %388 = vst [vmem:[#allocation2 + $0x20] sm:$0xff] %v361_v44  ;;  %v363_v45 = vpop.f32.mrb[9].mxu0 }
 0x1a6   :  { %v364_v46 = vpop.f32.mrb[10].mxu0 }
 0x1a7   :  { %389 = vst [vmem:[#allocation2 + $0x28] sm:$0xff] %v364_v46  ;;  %v366_v47 = vpop.f32.mrb[11].mxu0 }
 0x268   :  { %v1916_v56 = vpop.f32.mrb[0].mxu0 }
 0x269   :  { %v492_v57 = vpop.f32.mrb[1].mxu0  ;;  %v502_v58 = vadd.f32 %v1916_v56, %v419_v54 }
 0x26a   :  { %v501_v59 = vadd.f32 %v492_v57, %v418_v55 }
 0x26b   :  { %v504_v61 = vadd.f32 %v2716_v6, %v502_v58 }
 0x26c   :  { %v503_v60 = vadd.f32 %v2716_v6, %v501_v59 }
 0x26e   :  { %2227 = vtanh.f32 %v503_v60 }
 0x26f   :  { %2229 = vtanh.f32 %v504_v61 }
 0x278   :  { %v2228_v62 = vpop.eup %2227 }
 0x279   :  { %523 = vrot.lane.b32.xlu0 %v2228_v62, %s2496_s22  ;;  %v2230_v63 = vpop.eup %2229  ;;  %v507_v1 = vmul.f32 0.5, %v2228_v62 }
 0x27a   :  { %v508_v8 = vmul.f32 0.5, %v2230_v63 }
 0x27b   :  { %v509_v7 = vadd.f32 0.5, %v507_v1 }
 0x27c   :  { %v510_v11 = vadd.f32 0.5, %v508_v8 }
 0x27d   :  { %525 = vrot.lane.b32.xlu0 %v2230_v63, %s2496_s22  ;;  %v519_v15 = vmul.f32 %v514_v14, %v509_v7 }
 0x27e   :  { %v520_v19 = vmul.f32 %v516_v16, %v510_v11 }
 0x2eb   :  { %v524_v9 = vpop.permute.xlu0 %523 }
 0x2ec   :  { %v529_v10 = vmul.f32 %v524_v9, %v509_v7 }
 0x2ee   :  { %533 = vrot.lane.b32.xlu0 %v529_v10, %s2495_s1 }
 0x2ef   :  { %v526_v12 = vpop.permute.xlu0 %525 }
 0x2f0   :  { %v530_v13 = vmul.f32 %v526_v12, %v510_v11 }
 0x2f2   :  { %535 = vrot.lane.b32.xlu1 %v530_v13, %s2495_s1 }
 0x360   :  { %v534_v17 = vpop.permute.xlu0 %533 }
 0x361   :  { %v539_v18 = vadd.f32 %v534_v17, %v519_v15 }
 0x363   :  { %2231 = vtanh.f32 %v539_v18 }
 0x364   :  { %v536_v20 = vpop.permute.xlu1 %535 }
 0x365   :  { %v540_v21 = vadd.f32 %v536_v20, %v520_v19 }
 0x367   :  { %2233 = vtanh.f32 %v540_v21 }
 0x36d   :  { %v2232_v22 = vpop.eup %2231 }
 0x36e   :  { %545 = vrot.lane.b32.xlu0 %v2232_v22, %s2496_s22 }
 0x371   :  { %v2234_v23 = vpop.eup %2233 }
 0x372   :  { %547 = vrot.lane.b32.xlu1 %v2234_v23, %s2496_s22 }
 0x3e0   :  { %v546_v24 = vpop.permute.xlu0 %545 }
 0x3e1   :  { %v551_v25 = vmul.f32 %v546_v24, %v509_v7 }
 0x3e3   :  { %559 = vrot.lane.b32.xlu0 %v551_v25, %s2495_s1 }
 0x3e4   :  { %v548_v26 = vpop.permute.xlu1 %547 }
 0x3e5   :  { %v552_v27 = vmul.f32 %v548_v26, %v510_v11 }
 0x3e7   :  { %561 = vrot.lane.b32.xlu1 %v552_v27, %s2495_s1  ;;  %571 = vrot.lane.b32.xlu0 %v539_v18, %s2497_s19 }
 0x3eb   :  { %573 = vrot.lane.b32.xlu1 %v540_v21, %s2497_s19 }
 0x455   :  { %v560_v30 = vpop.permute.xlu0 %559 }
 0x456   :  { %v565_v31 = vsel %vm555_vm2, %v560_v30, %v2730_v50 }
 0x457   :  { %567 = vst.msk [vmem:[#allocation3] sm:$0xff] %vm405_vm0, %v565_v31 }
 0x459   :  { %v562_v32 = vpop.permute.xlu1 %561  ;;  %v572_v33 = vpop.permute.xlu0 %571 }
 0x45a   :  { %v566_v34 = vsel %vm556_vm3, %v562_v32, %v415_v53  ;;  %v577_v35 = vsel %vm555_vm2, %v572_v33, %v2732_v51 }
 0x45b   :  { %568 = vst.msk [vmem:[#allocation3 + $0x8] sm:$0xff] %vm405_vm0, %v566_v34  ;;  %579 = vst.msk [vmem:[#allocation4] sm:$0xff] %vm405_vm0, %v577_v35 }
 0x45d   :  { %v574_v36 = vpop.permute.xlu1 %573 }
 0x45e   :  { %v578_v37 = vsel %vm556_vm3, %v574_v36, %v2738_v52 }
 0x45f   :  { %580 = vst.msk [vmem:[#allocation4 + $0x8] sm:$0xff] %vm405_vm0, %v578_v37 }
 0x460 PF:  { %p1823_p9 = scmp.le.s32.totalorder %s2915_s0, 1 }
 0x461   :  { %v1969_v38 = vpack.c.bf16 (!%p1823_p9), %v2707_v3, %v2705_v2  ;;  %v1973_v39 = vpack.c.bf16 (!%p1823_p9), %v2711_v5, %v2709_v4  ;;  %v2763_v40 = vld [vmem:[#allocation3] sm:$0xff] (!%p1823_p9)  ;;  %s2498_s7 = smov (!%p1823_p9), 32   ;;  %v591_v44 = vld [vmem:[#allocation2 + $0x18] sm:$0xff] (!%p1823_p9)  ;;  %s2499_s25 = smov (!%p1823_p9), 64  }
 0x462   :  { %584 = sbr.rel (%p1823_p9) target bundleno = 1846 (0x736), region = 85  ;;  %v2765_v41 = vld [vmem:[#allocation4] sm:$0xff] (!%p1823_p9)  ;;  %1925 = vmatprep.mubr.msk.f32.mxu0 (!%p1823_p9), %vm405_vm0, %v2763_v40  ;;  %v586_v43 = vld [vmem:[#allocation3 + $0x8] sm:$0xff] (!%p1823_p9)  ;;  %v590_v45 = vld [vmem:[#allocation2 + $0x10] sm:$0xff] (!%p1823_p9)  ;;  %s2500_s5 = smov (!%p1823_p9), 96  }
 0x463   :  { %685 = vrot.lane.b32.xlu1 (!%p1823_p9), %v2765_v41, %s2498_s7  ;;  %1970 = vmatprep.subr.bf16.mxu0 (!%p1823_p9), %v1969_v38  ;;  %v726_v18 = vld [vmem:[#allocation10 + $0x10] sm:$0xff] (!%p1823_p9)  ;;  %v727_v19 = vld [vmem:[#allocation10 + $0x18] sm:$0xff] (!%p1823_p9) }
 0x464   :  { %1972 = vmatpush3.bf16.msra.mxu0 (!%p1823_p9), %v1969_v38  ;;  %vm728_vm4 = vcmp.gt.f32.partialorder (!%p1823_p9), %v726_v18, 0.0  ;;  %vm729_vm5 = vcmp.gt.f32.partialorder (!%p1823_p9), %v727_v19, 0.0 }
 0x465   :  { %1974 = vmatprep.subr.bf16.mxu0 (!%p1823_p9), %v1973_v39 }
 0x466   :  { %v2771_v42 = vld [vmem:[#allocation4 + $0x8] sm:$0xff] (!%p1823_p9) }
 0x467   :  { %687 = vrot.lane.b32.xlu1 (!%p1823_p9), %v2771_v42, %s2498_s7 }
 0x468   :  { %1976 = vmatpush3.bf16.msra.mxu0 (!%p1823_p9), %v1973_v39 }
 0x46b   :  { %1926 = vmatmul.mubr.msk.f32.vlgmr.msra.gmra.mrb[0].mxu0 %vm405_vm0, %v586_v43 }
 0x4d5   :  { %v686_v62 = vpop.permute.xlu1 %685 }
 0x4d9   :  { %v688_v1 = vpop.permute.xlu1 %687 }
 0x53e   :  { %v1927_v46 = vpop.f32.mrb[0].mxu0 }
 0x53f   :  { %v664_v47 = vpop.f32.mrb[1].mxu0  ;;  %v674_v48 = vadd.f32 %v1927_v46, %v591_v44 }
 0x540   :  { %v673_v49 = vadd.f32 %v664_v47, %v590_v45 }
 0x541   :  { %v676_v51 = vadd.f32 %v2716_v6, %v674_v48 }
 0x542   :  { %v675_v50 = vadd.f32 %v2716_v6, %v673_v49 }
 0x544   :  { %2235 = vtanh.f32 %v675_v50 }
 0x545   :  { %2237 = vtanh.f32 %v676_v51 }
 0x54e   :  { %v2236_v52 = vpop.eup %2235 }
 0x54f   :  { %695 = vrot.lane.b32.xlu0 %v2236_v52, %s2499_s25  ;;  %v2238_v53 = vpop.eup %2237  ;;  %v679_v54 = vmul.f32 0.5, %v2236_v52 }
 0x550   :  { %v680_v56 = vmul.f32 0.5, %v2238_v53 }
 0x551   :  { %v681_v55 = vadd.f32 0.5, %v679_v54 }
 0x552   :  { %v682_v59 = vadd.f32 0.5, %v680_v56 }
 0x553   :  { %697 = vrot.lane.b32.xlu0 %v2238_v53, %s2499_s25  ;;  %v691_v63 = vmul.f32 %v686_v62, %v681_v55 }
 0x554   :  { %v692_v9 = vmul.f32 %v688_v1, %v682_v59 }
 0x5c1   :  { %v696_v57 = vpop.permute.xlu0 %695 }
 0x5c2   :  { %v701_v58 = vmul.f32 %v696_v57, %v681_v55 }
 0x5c4   :  { %705 = vrot.lane.b32.xlu0 %v701_v58, %s2498_s7 }
 0x5c5   :  { %v698_v60 = vpop.permute.xlu0 %697 }
 0x5c6   :  { %v702_v61 = vmul.f32 %v698_v60, %v682_v59 }
 0x5c8   :  { %707 = vrot.lane.b32.xlu1 %v702_v61, %s2498_s7 }
 0x636   :  { %v706_v7 = vpop.permute.xlu0 %705 }
 0x637   :  { %v711_v8 = vadd.f32 %v706_v7, %v691_v63 }
 0x639   :  { %2239 = vtanh.f32 %v711_v8 }
 0x63a   :  { %v708_v10 = vpop.permute.xlu1 %707 }
 0x63b   :  { %v712_v11 = vadd.f32 %v708_v10, %v692_v9 }
 0x63d   :  { %2241 = vtanh.f32 %v712_v11 }
 0x643   :  { %v2240_v12 = vpop.eup %2239 }
 0x644   :  { %717 = vrot.lane.b32.xlu0 %v2240_v12, %s2499_s25 }
 0x647   :  { %v2242_v13 = vpop.eup %2241 }
 0x648   :  { %719 = vrot.lane.b32.xlu1 %v2242_v13, %s2499_s25 }
 0x6b6   :  { %v718_v14 = vpop.permute.xlu0 %717 }
 0x6b7   :  { %v723_v15 = vmul.f32 %v718_v14, %v681_v55 }
 0x6b9   :  { %732 = vrot.lane.b32.xlu0 %v723_v15, %s2498_s7 }
 0x6ba   :  { %v720_v16 = vpop.permute.xlu1 %719 }
 0x6bb   :  { %v724_v17 = vmul.f32 %v720_v16, %v682_v59 }
 0x6bd   :  { %734 = vrot.lane.b32.xlu1 %v724_v17, %s2498_s7  ;;  %744 = vrot.lane.b32.xlu0 %v711_v8, %s2500_s5 }
 0x6c1   :  { %746 = vrot.lane.b32.xlu1 %v712_v11, %s2500_s5 }
 0x72b   :  { %v733_v20 = vpop.permute.xlu0 %732 }
 0x72c   :  { %v738_v21 = vsel %vm728_vm4, %v733_v20, %v2763_v40 }
 0x72d   :  { %740 = vst.msk [vmem:[#allocation3] sm:$0xff] %vm405_vm0, %v738_v21 }
 0x72f   :  { %v735_v22 = vpop.permute.xlu1 %734  ;;  %v745_v23 = vpop.permute.xlu0 %744 }
 0x730   :  { %v739_v24 = vsel %vm729_vm5, %v735_v22, %v586_v43  ;;  %v750_v25 = vsel %vm728_vm4, %v745_v23, %v2765_v41 }
 0x731   :  { %741 = vst.msk [vmem:[#allocation3 + $0x8] sm:$0xff] %vm405_vm0, %v739_v24  ;;  %752 = vst.msk [vmem:[#allocation4] sm:$0xff] %vm405_vm0, %v750_v25 }
 0x733   :  { %v747_v26 = vpop.permute.xlu1 %746 }
 0x734   :  { %v751_v27 = vsel %vm729_vm5, %v747_v26, %v2771_v42 }
 0x735   :  { %753 = vst.msk [vmem:[#allocation4 + $0x8] sm:$0xff] %vm405_vm0, %v751_v27 }
 0x736 PF:  { %p1826_p10 = scmp.le.s32.totalorder %s2915_s0, 2 }
 0x737   :  { %v1977_v28 = vpack.c.bf16 (!%p1826_p10), %v2707_v3, %v2705_v2  ;;  %v1981_v29 = vpack.c.bf16 (!%p1826_p10), %v2711_v5, %v2709_v4  ;;  %v2796_v30 = vld [vmem:[#allocation3] sm:$0xff] (!%p1826_p10)  ;;  %s2501_s27 = smov (!%p1826_p10), 32   ;;  %v764_v34 = vld [vmem:[#allocation2 + $0x28] sm:$0xff] (!%p1826_p10)  ;;  %v763_v35 = vld [vmem:[#allocation2 + $0x20] sm:$0xff] (!%p1826_p10)  ;;  %s2502_s28 = smov (!%p1826_p10), 64  }
 0x738   :  { %757 = sbr.rel (%p1826_p10) target bundleno = 2572 (0xa0c), region = 89  ;;  %v2798_v31 = vld [vmem:[#allocation4] sm:$0xff] (!%p1826_p10)  ;;  %1936 = vmatprep.mubr.msk.f32.mxu0 (!%p1826_p10), %vm405_vm0, %v2796_v30  ;;  %v759_v33 = vld [vmem:[#allocation3 + $0x8] sm:$0xff] (!%p1826_p10)  ;;  %s2503_s2 = smov (!%p1826_p10), 96   ;;  %v900_v9 = vld [vmem:[#allocation10 + $0x28] sm:$0xff] (!%p1826_p10) }
 0x739   :  { %858 = vrot.lane.b32.xlu1 (!%p1826_p10), %v2798_v31, %s2501_s27  ;;  %1978 = vmatprep.subr.bf16.mxu0 (!%p1826_p10), %v1977_v28  ;;  %v899_v8 = vld [vmem:[#allocation10 + $0x20] sm:$0xff] (!%p1826_p10)  ;;  %vm902_vm7 = vcmp.gt.f32.partialorder (!%p1826_p10), %v900_v9, 0.0 }
 0x73a   :  { %1980 = vmatpush3.bf16.msra.mxu0 (!%p1826_p10), %v1977_v28  ;;  %vm901_vm6 = vcmp.gt.f32.partialorder (!%p1826_p10), %v899_v8, 0.0 }
 0x73b   :  { %1982 = vmatprep.subr.bf16.mxu0 (!%p1826_p10), %v1981_v29 }
 0x73c   :  { %v2804_v32 = vld [vmem:[#allocation4 + $0x8] sm:$0xff] (!%p1826_p10) }
 0x73d   :  { %860 = vrot.lane.b32.xlu1 (!%p1826_p10), %v2804_v32, %s2501_s27 }
 0x73e   :  { %1984 = vmatpush3.bf16.msra.mxu0 (!%p1826_p10), %v1981_v29 }
 0x741   :  { %1937 = vmatmul.mubr.msk.f32.vlgmr.msra.gmra.mrb[0].mxu0 %vm405_vm0, %v759_v33 }
 0x7ab   :  { %v859_v52 = vpop.permute.xlu1 %858 }
 0x7af   :  { %v861_v54 = vpop.permute.xlu1 %860 }
 0x814   :  { %v1938_v36 = vpop.f32.mrb[0].mxu0 }
 0x815   :  { %v837_v37 = vpop.f32.mrb[1].mxu0  ;;  %v847_v38 = vadd.f32 %v1938_v36, %v764_v34 }
 0x816   :  { %v846_v39 = vadd.f32 %v837_v37, %v763_v35 }
 0x817   :  { %v849_v41 = vadd.f32 %v2716_v6, %v847_v38 }
 0x818   :  { %v848_v40 = vadd.f32 %v2716_v6, %v846_v39 }
 0x81a   :  { %2243 = vtanh.f32 %v848_v40 }
 0x81b   :  { %2245 = vtanh.f32 %v849_v41 }
 0x824   :  { %v2244_v42 = vpop.eup %2243 }
 0x825   :  { %868 = vrot.lane.b32.xlu0 %v2244_v42, %s2502_s28  ;;  %v2246_v43 = vpop.eup %2245  ;;  %v852_v44 = vmul.f32 0.5, %v2244_v42 }
 0x826   :  { %v853_v46 = vmul.f32 0.5, %v2246_v43 }
 0x827   :  { %v854_v45 = vadd.f32 0.5, %v852_v44 }
 0x828   :  { %v855_v49 = vadd.f32 0.5, %v853_v46 }
 0x829   :  { %870 = vrot.lane.b32.xlu0 %v2246_v43, %s2502_s28  ;;  %v864_v53 = vmul.f32 %v859_v52, %v854_v45 }
 0x82a   :  { %v865_v57 = vmul.f32 %v861_v54, %v855_v49 }
 0x897   :  { %v869_v47 = vpop.permute.xlu0 %868 }
 0x898   :  { %v874_v48 = vmul.f32 %v869_v47, %v854_v45 }
 0x89a   :  { %878 = vrot.lane.b32.xlu0 %v874_v48, %s2501_s27 }
 0x89b   :  { %v871_v50 = vpop.permute.xlu0 %870 }
 0x89c   :  { %v875_v51 = vmul.f32 %v871_v50, %v855_v49 }
 0x89e   :  { %880 = vrot.lane.b32.xlu1 %v875_v51, %s2501_s27 }
 0x90c   :  { %v879_v55 = vpop.permute.xlu0 %878 }
 0x90d   :  { %v884_v56 = vadd.f32 %v879_v55, %v864_v53 }
 0x90f   :  { %2247 = vtanh.f32 %v884_v56 }
 0x910   :  { %v881_v58 = vpop.permute.xlu1 %880 }
 0x911   :  { %v885_v59 = vadd.f32 %v881_v58, %v865_v57 }
 0x913   :  { %2249 = vtanh.f32 %v885_v59 }
 0x919   :  { %v2248_v60 = vpop.eup %2247 }
 0x91a   :  { %890 = vrot.lane.b32.xlu0 %v2248_v60, %s2502_s28 }
 0x91d   :  { %v2250_v61 = vpop.eup %2249 }
 0x91e   :  { %892 = vrot.lane.b32.xlu1 %v2250_v61, %s2502_s28 }
 0x98c   :  { %v891_v62 = vpop.permute.xlu0 %890 }
 0x98d   :  { %v896_v63 = vmul.f32 %v891_v62, %v854_v45 }
 0x98f   :  { %905 = vrot.lane.b32.xlu0 %v896_v63, %s2501_s27 }
 0x990   :  { %v893_v1 = vpop.permute.xlu1 %892 }
 0x991   :  { %v897_v7 = vmul.f32 %v893_v1, %v855_v49 }
 0x993   :  { %907 = vrot.lane.b32.xlu1 %v897_v7, %s2501_s27  ;;  %917 = vrot.lane.b32.xlu0 %v884_v56, %s2503_s2 }
 0x997   :  { %919 = vrot.lane.b32.xlu1 %v885_v59, %s2503_s2 }
 0xa01   :  { %v906_v10 = vpop.permute.xlu0 %905 }
 0xa02   :  { %v911_v11 = vsel %vm901_vm6, %v906_v10, %v2796_v30 }
 0xa03   :  { %913 = vst.msk [vmem:[#allocation3] sm:$0xff] %vm405_vm0, %v911_v11 }
 0xa05   :  { %v908_v12 = vpop.permute.xlu1 %907  ;;  %v918_v13 = vpop.permute.xlu0 %917 }
 0xa06   :  { %v912_v14 = vsel %vm902_vm7, %v908_v12, %v759_v33  ;;  %v923_v15 = vsel %vm901_vm6, %v918_v13, %v2798_v31 }
 0xa07   :  { %914 = vst.msk [vmem:[#allocation3 + $0x8] sm:$0xff] %vm405_vm0, %v912_v14  ;;  %925 = vst.msk [vmem:[#allocation4] sm:$0xff] %vm405_vm0, %v923_v15 }
 0xa09   :  { %v920_v16 = vpop.permute.xlu1 %919 }
 0xa0a   :  { %v924_v17 = vsel %vm902_vm7, %v920_v16, %v2804_v32 }
 0xa0b   :  { %926 = vst.msk [vmem:[#allocation4 + $0x8] sm:$0xff] %vm405_vm0, %v924_v17 }
 0xa0c PF:  { %p1829_p11 = scmp.le.s32.totalorder %s2915_s0, 3 }
 0xa0d   :  { %v1985_v18 = vpack.c.bf16 (!%p1829_p11), %v2707_v3, %v2705_v2  ;;  %v1989_v19 = vpack.c.bf16 (!%p1829_p11), %v2711_v5, %v2709_v4  ;;  %v2829_v20 = vld [vmem:[#allocation3] sm:$0xff] (!%p1829_p11)  ;;  %s2504_s3 = smov (!%p1829_p11), 32   ;;  %v937_v24 = vld [vmem:[#allocation2 + $0x38] sm:$0xff] (!%p1829_p11)  ;;  %s2505_s30 = smov (!%p1829_p11), 64  }
 0xa0e   :  { %930 = sbr.rel (%p1829_p11) target bundleno = 3298 (0xce2), region = 93  ;;  %v2831_v21 = vld [vmem:[#allocation4] sm:$0xff] (!%p1829_p11)  ;;  %1947 = vmatprep.mubr.msk.f32.mxu0 (!%p1829_p11), %vm405_vm0, %v2829_v20  ;;  %v932_v23 = vld [vmem:[#allocation3 + $0x8] sm:$0xff] (!%p1829_p11)  ;;  %v936_v25 = vld [vmem:[#allocation2 + $0x30] sm:$0xff] (!%p1829_p11)  ;;  %s2506_s17 = smov (!%p1829_p11), 96  }
 0xa0f   :  { %1031 = vrot.lane.b32.xlu1 (!%p1829_p11), %v2831_v21, %s2504_s3  ;;  %1986 = vmatprep.subr.bf16.mxu0 (!%p1829_p11), %v1985_v18  ;;  %v1072_v56 = vld [vmem:[#allocation10 + $0x30] sm:$0xff] (!%p1829_p11)  ;;  %v1073_v57 = vld [vmem:[#allocation10 + $0x38] sm:$0xff] (!%p1829_p11) }
 0xa10   :  { %1988 = vmatpush3.bf16.msra.mxu0 (!%p1829_p11), %v1985_v18  ;;  %vm1074_vm8 = vcmp.gt.f32.partialorder (!%p1829_p11), %v1072_v56, 0.0  ;;  %vm1075_vm9 = vcmp.gt.f32.partialorder (!%p1829_p11), %v1073_v57, 0.0 }
 0xa11   :  { %1990 = vmatprep.subr.bf16.mxu0 (!%p1829_p11), %v1989_v19 }
 0xa12   :  { %v2837_v22 = vld [vmem:[#allocation4 + $0x8] sm:$0xff] (!%p1829_p11) }
 0xa13   :  { %1033 = vrot.lane.b32.xlu1 (!%p1829_p11), %v2837_v22, %s2504_s3 }
 0xa14   :  { %1992 = vmatpush3.bf16.msra.mxu0 (!%p1829_p11), %v1989_v19 }
 0xa17   :  { %1948 = vmatmul.mubr.msk.f32.vlgmr.msra.gmra.mrb[0].mxu0 %vm405_vm0, %v932_v23 }
 0xa81   :  { %v1032_v42 = vpop.permute.xlu1 %1031 }
 0xa85   :  { %v1034_v44 = vpop.permute.xlu1 %1033 }
 0xaea   :  { %v1949_v26 = vpop.f32.mrb[0].mxu0 }
 0xaeb   :  { %v1010_v27 = vpop.f32.mrb[1].mxu0  ;;  %v1020_v28 = vadd.f32 %v1949_v26, %v937_v24 }
 0xaec   :  { %v1019_v29 = vadd.f32 %v1010_v27, %v936_v25 }
 0xaed   :  { %v1022_v31 = vadd.f32 %v2716_v6, %v1020_v28 }
 0xaee   :  { %v1021_v30 = vadd.f32 %v2716_v6, %v1019_v29 }
 0xaf0   :  { %2251 = vtanh.f32 %v1021_v30 }
 0xaf1   :  { %2253 = vtanh.f32 %v1022_v31 }
 0xafa   :  { %v2252_v32 = vpop.eup %2251 }
 0xafb   :  { %1041 = vrot.lane.b32.xlu0 %v2252_v32, %s2505_s30  ;;  %v2254_v33 = vpop.eup %2253  ;;  %v1025_v34 = vmul.f32 0.5, %v2252_v32 }
 0xafc   :  { %v1026_v36 = vmul.f32 0.5, %v2254_v33 }
 0xafd   :  { %v1027_v35 = vadd.f32 0.5, %v1025_v34 }
 0xafe   :  { %v1028_v39 = vadd.f32 0.5, %v1026_v36 }
 0xaff   :  { %1043 = vrot.lane.b32.xlu0 %v2254_v33, %s2505_s30  ;;  %v1037_v43 = vmul.f32 %v1032_v42, %v1027_v35 }
 0xb00   :  { %v1038_v47 = vmul.f32 %v1034_v44, %v1028_v39 }
 0xb6d   :  { %v1042_v37 = vpop.permute.xlu0 %1041 }
 0xb6e   :  { %v1047_v38 = vmul.f32 %v1042_v37, %v1027_v35 }
 0xb70   :  { %1051 = vrot.lane.b32.xlu0 %v1047_v38, %s2504_s3 }
 0xb71   :  { %v1044_v40 = vpop.permute.xlu0 %1043 }
 0xb72   :  { %v1048_v41 = vmul.f32 %v1044_v40, %v1028_v39 }
 0xb74   :  { %1053 = vrot.lane.b32.xlu1 %v1048_v41, %s2504_s3 }
 0xbe2   :  { %v1052_v45 = vpop.permute.xlu0 %1051 }
 0xbe3   :  { %v1057_v46 = vadd.f32 %v1052_v45, %v1037_v43 }
 0xbe5   :  { %2255 = vtanh.f32 %v1057_v46 }
 0xbe6   :  { %v1054_v48 = vpop.permute.xlu1 %1053 }
 0xbe7   :  { %v1058_v49 = vadd.f32 %v1054_v48, %v1038_v47 }
 0xbe9   :  { %2257 = vtanh.f32 %v1058_v49 }
 0xbef   :  { %v2256_v50 = vpop.eup %2255 }
 0xbf0   :  { %1063 = vrot.lane.b32.xlu0 %v2256_v50, %s2505_s30 }
 0xbf3   :  { %v2258_v51 = vpop.eup %2257 }
 0xbf4   :  { %1065 = vrot.lane.b32.xlu1 %v2258_v51, %s2505_s30 }
 0xc62   :  { %v1064_v52 = vpop.permute.xlu0 %1063 }
 0xc63   :  { %v1069_v53 = vmul.f32 %v1064_v52, %v1027_v35 }
 0xc65   :  { %1078 = vrot.lane.b32.xlu0 %v1069_v53, %s2504_s3 }
 0xc66   :  { %v1066_v54 = vpop.permute.xlu1 %1065 }
 0xc67   :  { %v1070_v55 = vmul.f32 %v1066_v54, %v1028_v39 }
 0xc69   :  { %1080 = vrot.lane.b32.xlu1 %v1070_v55, %s2504_s3  ;;  %1090 = vrot.lane.b32.xlu0 %v1057_v46, %s2506_s17 }
 0xc6d   :  { %1092 = vrot.lane.b32.xlu1 %v1058_v49, %s2506_s17 }
 0xcd7   :  { %v1079_v58 = vpop.permute.xlu0 %1078 }
 0xcd8   :  { %v1084_v59 = vsel %vm1074_vm8, %v1079_v58, %v2829_v20 }
 0xcd9   :  { %1086 = vst.msk [vmem:[#allocation3] sm:$0xff] %vm405_vm0, %v1084_v59 }
 0xcdb   :  { %v1081_v60 = vpop.permute.xlu1 %1080  ;;  %v1091_v61 = vpop.permute.xlu0 %1090 }
 0xcdc   :  { %v1085_v62 = vsel %vm1075_vm9, %v1081_v60, %v932_v23  ;;  %v1096_v63 = vsel %vm1074_vm8, %v1091_v61, %v2831_v21 }
 0xcdd   :  { %1087 = vst.msk [vmem:[#allocation3 + $0x8] sm:$0xff] %vm405_vm0, %v1085_v62  ;;  %1098 = vst.msk [vmem:[#allocation4] sm:$0xff] %vm405_vm0, %v1096_v63 }
 0xcdf   :  { %v1093_v1 = vpop.permute.xlu1 %1092 }
 0xce0   :  { %v1097_v7 = vsel %vm1075_vm9, %v1093_v1, %v2837_v22 }
 0xce1   :  { %1099 = vst.msk [vmem:[#allocation4 + $0x8] sm:$0xff] %vm405_vm0, %v1097_v7 }
 0xce2 PF:  { %p1832_p12 = scmp.le.s32.totalorder %s2915_s0, 4 }
 0xce3   :  { %v1993_v8 = vpack.c.bf16 (!%p1832_p12), %v2707_v3, %v2705_v2  ;;  %v1997_v9 = vpack.c.bf16 (!%p1832_p12), %v2711_v5, %v2709_v4  ;;  %v2862_v10 = vld [vmem:[#allocation3] sm:$0xff] (!%p1832_p12)  ;;  %s2507_s4 = smov (!%p1832_p12), 32   ;;  %v1110_v3 = vld [vmem:[#allocation2 + $0x48] sm:$0xff] (!%p1832_p12)  ;;  %v1109_v4 = vld [vmem:[#allocation2 + $0x40] sm:$0xff] (!%p1832_p12)  ;;  %s2508_s0 = smov (!%p1832_p12), 64  }
 0xce4   :  { %1103 = sbr.rel (%p1832_p12) target bundleno = 4024 (0xfb8), region = 97  ;;  %v2864_v11 = vld [vmem:[#allocation4] sm:$0xff] (!%p1832_p12)  ;;  %1958 = vmatprep.mubr.msk.f32.mxu0 (!%p1832_p12), %vm405_vm0, %v2862_v10  ;;  %v1105_v2 = vld [vmem:[#allocation3 + $0x8] sm:$0xff] (!%p1832_p12)  ;;  %s2509_s10 = smov (!%p1832_p12), 96   ;;  %v1246_v42 = vld [vmem:[#allocation10 + $0x48] sm:$0xff] (!%p1832_p12) }
 0xce5   :  { %1204 = vrot.lane.b32.xlu1 (!%p1832_p12), %v2864_v11, %s2507_s4  ;;  %1994 = vmatprep.subr.bf16.mxu0 (!%p1832_p12), %v1993_v8  ;;  %v1245_v41 = vld [vmem:[#allocation10 + $0x40] sm:$0xff] (!%p1832_p12)  ;;  %vm1248_vm11 = vcmp.gt.f32.partialorder (!%p1832_p12), %v1246_v42, 0.0 }
 0xce6   :  { %1996 = vmatpush3.bf16.msra.mxu0 (!%p1832_p12), %v1993_v8  ;;  %vm1247_vm10 = vcmp.gt.f32.partialorder (!%p1832_p12), %v1245_v41, 0.0 }
 0xce7   :  { %1998 = vmatprep.subr.bf16.mxu0 (!%p1832_p12), %v1997_v9 }
 0xce8   :  { %v2870_v12 = vld [vmem:[#allocation4 + $0x8] sm:$0xff] (!%p1832_p12) }
 0xce9   :  { %1206 = vrot.lane.b32.xlu1 (!%p1832_p12), %v2870_v12, %s2507_s4 }
 0xcea   :  { %2000 = vmatpush3.bf16.msra.mxu0 (!%p1832_p12), %v1997_v9 }
 0xced   :  { %1959 = vmatmul.mubr.msk.f32.vlgmr.msra.gmra.mrb[0].mxu0 %vm405_vm0, %v1105_v2 }
 0xdc0   :  { %v1960_v5 = vpop.f32.mrb[0].mxu0 }
 0xdc1   :  { %v1183_v13 = vpop.f32.mrb[1].mxu0  ;;  %v1193_v14 = vadd.f32 %v1960_v5, %v1110_v3 }
 0xdc2   :  { %v1192_v15 = vadd.f32 %v1183_v13, %v1109_v4 }
 0xdc3   :  { %v1195_v17 = vadd.f32 %v2716_v6, %v1193_v14 }
 0xdc4   :  { %v1194_v16 = vadd.f32 %v2716_v6, %v1192_v15  ;;  %v1205_v6 = vpop.permute.xlu1 %1204 }
 0xdc6   :  { %2259 = vtanh.f32 %v1194_v16 }
 0xdc7   :  { %2261 = vtanh.f32 %v1195_v17 }
 0xdc8   :  { %v1207_v29 = vpop.permute.xlu1 %1206 }
 0xdd0   :  { %v2260_v18 = vpop.eup %2259 }
 0xdd1   :  { %1214 = vrot.lane.b32.xlu0 %v2260_v18, %s2508_s0  ;;  %v2262_v19 = vpop.eup %2261  ;;  %v1198_v20 = vmul.f32 0.5, %v2260_v18 }
 0xdd2   :  { %v1199_v22 = vmul.f32 0.5, %v2262_v19 }
 0xdd3   :  { %v1200_v21 = vadd.f32 0.5, %v1198_v20 }
 0xdd4   :  { %v1201_v25 = vadd.f32 0.5, %v1199_v22 }
 0xdd5   :  { %1216 = vrot.lane.b32.xlu0 %v2262_v19, %s2508_s0  ;;  %v1210_v28 = vmul.f32 %v1205_v6, %v1200_v21 }
 0xdd6   :  { %v1211_v32 = vmul.f32 %v1207_v29, %v1201_v25 }
 0xe43   :  { %v1215_v23 = vpop.permute.xlu0 %1214 }
 0xe44   :  { %v1220_v24 = vmul.f32 %v1215_v23, %v1200_v21 }
 0xe46   :  { %1224 = vrot.lane.b32.xlu0 %v1220_v24, %s2507_s4 }
 0xe47   :  { %v1217_v26 = vpop.permute.xlu0 %1216 }
 0xe48   :  { %v1221_v27 = vmul.f32 %v1217_v26, %v1201_v25 }
 0xe4a   :  { %1226 = vrot.lane.b32.xlu1 %v1221_v27, %s2507_s4 }
 0xeb8   :  { %v1225_v30 = vpop.permute.xlu0 %1224 }
 0xeb9   :  { %v1230_v31 = vadd.f32 %v1225_v30, %v1210_v28 }
 0xebb   :  { %2263 = vtanh.f32 %v1230_v31 }
 0xebc   :  { %v1227_v33 = vpop.permute.xlu1 %1226 }
 0xebd   :  { %v1231_v34 = vadd.f32 %v1227_v33, %v1211_v32 }
 0xebf   :  { %2265 = vtanh.f32 %v1231_v34 }
 0xec5   :  { %v2264_v35 = vpop.eup %2263 }
 0xec6   :  { %1236 = vrot.lane.b32.xlu0 %v2264_v35, %s2508_s0 }
 0xec9   :  { %v2266_v36 = vpop.eup %2265 }
 0xeca   :  { %1238 = vrot.lane.b32.xlu1 %v2266_v36, %s2508_s0 }
 0xf38   :  { %v1237_v37 = vpop.permute.xlu0 %1236 }
 0xf39   :  { %v1242_v38 = vmul.f32 %v1237_v37, %v1200_v21 }
 0xf3b   :  { %1251 = vrot.lane.b32.xlu0 %v1242_v38, %s2507_s4 }
 0xf3c   :  { %v1239_v39 = vpop.permute.xlu1 %1238 }
 0xf3d   :  { %v1243_v40 = vmul.f32 %v1239_v39, %v1201_v25 }
 0xf3f   :  { %1253 = vrot.lane.b32.xlu1 %v1243_v40, %s2507_s4  ;;  %1263 = vrot.lane.b32.xlu0 %v1230_v31, %s2509_s10 }
 0xf43   :  { %1265 = vrot.lane.b32.xlu1 %v1231_v34, %s2509_s10 }
 0xfad   :  { %v1252_v43 = vpop.permute.xlu0 %1251 }
 0xfae   :  { %v1257_v44 = vsel %vm1247_vm10, %v1252_v43, %v2862_v10 }
 0xfaf   :  { %1259 = vst.msk [vmem:[#allocation3] sm:$0xff] %vm405_vm0, %v1257_v44 }
 0xfb1   :  { %v1254_v45 = vpop.permute.xlu1 %1253  ;;  %v1264_v46 = vpop.permute.xlu0 %1263 }
 0xfb2   :  { %v1258_v47 = vsel %vm1248_vm11, %v1254_v45, %v1105_v2  ;;  %v1269_v48 = vsel %vm1247_vm10, %v1264_v46, %v2864_v11 }
 0xfb3   :  { %1260 = vst.msk [vmem:[#allocation3 + $0x8] sm:$0xff] %vm405_vm0, %v1258_v47  ;;  %1271 = vst.msk [vmem:[#allocation4] sm:$0xff] %vm405_vm0, %v1269_v48 }
 0xfb5   :  { %v1266_v49 = vpop.permute.xlu1 %1265 }
 0xfb6   :  { %v1270_v50 = vsel %vm1248_vm11, %v1266_v49, %v2870_v12 }
 0xfb7   :  { %1272 = vst.msk [vmem:[#allocation4 + $0x8] sm:$0xff] %vm405_vm0, %v1270_v50 }
 0xfb8 PF:  { %v1290_v51 = vld [vmem:[#allocation18 + $0x8] sm:$0xff]  ;;  %v1292_v52 = vld [vmem:[#allocation18 + $0x18] sm:$0xff]  ;;  %v1289_v53 = vld [vmem:[#allocation18] sm:$0xff]  ;;  %1526 = vmatprep.mubr.f32.mxu1 %v2493_v0  ;;  %s2510_s1 = smov [#allocation21]  }
 0xfb9   :  { %v2001_v54 = vpack.c.bf16 %v1292_v52, %v1290_v51  ;;  %v1291_v55 = vld [vmem:[#allocation18 + $0x10] sm:$0xff]  ;;  %v1294_v56 = vld [vmem:[#allocation18 + $0x28] sm:$0xff]  ;;  %v1296_v57 = vld [vmem:[#allocation18 + $0x38] sm:$0xff]  ;;  %s1777_s22 = sshll.u32 %s2510_s1, 4  ;;  %s1778_s22 = int_to_ptr.vmem [resolvable:$true] %s1777_s22 }
 0xfba   :  { %v2003_v58 = vpack.c.bf16 %v1291_v55, %v1289_v53  ;;  %v2005_v59 = vpack.c.bf16 %v1296_v57, %v1294_v56  ;;  %v1293_v60 = vld [vmem:[#allocation18 + $0x20] sm:$0xff]  ;;  %v1295_v61 = vld [vmem:[#allocation18 + $0x30] sm:$0xff]  ;;  %v1298_v62 = vld [vmem:[#allocation18 + $0x48] sm:$0xff]  ;;  %s2443_s19 = scalar_lea.vmem %s1778_s22, 256  ;;  %p2448_p0 = scmp.lt.s32.totalorder %s1778_s22, %s1778_s22 }
 0xfbb   :  { %2002 = vmatprep.subr.bf16.mxu0 %v2001_v54  ;;  %v1300_v63 = vld [vmem:[#allocation18 + $0x58] sm:$0xff]  ;;  %v2007_v1 = vpack.c.bf16 %v1295_v61, %v1293_v60  ;;  %v1297_v8 = vld [vmem:[#allocation18 + $0x40] sm:$0xff]  ;;  %v1299_v9 = vld [vmem:[#allocation18 + $0x50] sm:$0xff]  ;;  %p2444_p13 = scmp.ne.s32.totalorder %s1778_s22, %s2443_s19  ;;  %p2449_p1 = scmp.lt.s32.totalorder %s2443_s19, %s2443_s19 }
 0xfbc   :  { %2004 = vmatpush1.bf16.msra.mxu0 %v2003_v58  ;;  %v2009_v7 = vpack.c.bf16 %v1300_v63, %v1298_v62  ;;  %v1302_v10 = vld [vmem:[#allocation18 + $0x68] sm:$0xff]  ;;  %v1304_v11 = vld [vmem:[#allocation18 + $0x78] sm:$0xff]  ;;  %v2011_v12 = vpack.c.bf16 %v1299_v9, %v1297_v8  ;;  %v1301_v3 = vld [vmem:[#allocation18 + $0x60] sm:$0xff] }
 0xfbd   :  { %2006 = vmatprep.subr.bf16.mxu0 %v2005_v59  ;;  %v2013_v2 = vpack.c.bf16 %v1304_v11, %v1302_v10  ;;  %v1303_v4 = vld [vmem:[#allocation18 + $0x70] sm:$0xff]  ;;  %v1306_v5 = vld [vmem:[#allocation18 + $0x88] sm:$0xff]  ;;  %v1308_v13 = vld [vmem:[#allocation18 + $0x98] sm:$0xff]  ;;  %p2450_p2 = por %p2449_p1, %p2448_p0 }
 0xfbe   :  { %v1354_v14 = vld [vmem:[#allocation18 + $0x208] sm:$0xff]  ;;  %v1356_v15 = vld [vmem:[#allocation18 + $0x218] sm:$0xff]  ;;  %v2015_v16 = vpack.c.bf16 %v1303_v4, %v1301_v3  ;;  %v1305_v17 = vld [vmem:[#allocation18 + $0x80] sm:$0xff]  ;;  %v2017_v20 = vpack.c.bf16 %v1308_v13, %v1306_v5 }
 0xfbf   :  { %v2065_v18 = vpack.c.bf16 %v1356_v15, %v1354_v14  ;;  %v1353_v19 = vld [vmem:[#allocation18 + $0x200] sm:$0xff]  ;;  %v1307_v21 = vld [vmem:[#allocation18 + $0x90] sm:$0xff]  ;;  %v1310_v22 = vld [vmem:[#allocation18 + $0xa8] sm:$0xff]  ;;  %p2451_p3 = pnand %p2450_p2, %p2444_p13 }
 0xfc0   :  { %2008 = vmatpush1.bf16.msra.mxu0 %v2007_v1  ;;  %v1355_v23 = vld [vmem:[#allocation18 + $0x210] sm:$0xff]  ;;  %v1312_v24 = vld [vmem:[#allocation18 + $0xb8] sm:$0xff]  ;;  %v1358_v26 = vld [vmem:[#allocation18 + $0x228] sm:$0xff]  ;;  %v2019_v30 = vpack.c.bf16 %v1307_v21, %v1305_v17 }
 0xfc1   :  { %2010 = vmatprep.subr.bf16.mxu0 %v2009_v7  ;;  %2066 = vmatprep.subr.bf16.mxu1 %v2065_v18  ;;  %v2067_v25 = vpack.c.bf16 %v1355_v23, %v1353_v19  ;;  %v1360_v27 = vld [vmem:[#allocation18 + $0x238] sm:$0xff]  ;;  %v1357_v28 = vld [vmem:[#allocation18 + $0x220] sm:$0xff]  ;;  %v1359_v29 = vld [vmem:[#allocation18 + $0x230] sm:$0xff]  ;;  %v2021_v34 = vpack.c.bf16 %v1312_v24, %v1310_v22 }
 0xfc2   :  { %v2069_v6 = vpack.c.bf16 %v1360_v27, %v1358_v26  ;;  %v1309_v31 = vld [vmem:[#allocation18 + $0xa0] sm:$0xff]  ;;  %v2071_v32 = vpack.c.bf16 %v1359_v29, %v1357_v28  ;;  %v1362_v33 = vld [vmem:[#allocation18 + $0x248] sm:$0xff]  ;;  %v1311_v35 = vld [vmem:[#allocation18 + $0xb0] sm:$0xff] }
 0xfc3   :  { %2068 = vmatpush1.bf16.msra.mxu1 %v2067_v25  ;;  %v1314_v36 = vld [vmem:[#allocation18 + $0xc8] sm:$0xff]  ;;  %v1364_v37 = vld [vmem:[#allocation18 + $0x258] sm:$0xff]  ;;  %v1361_v40 = vld [vmem:[#allocation18 + $0x240] sm:$0xff]  ;;  %v2023_v44 = vpack.c.bf16 %v1311_v35, %v1309_v31 }
 0xfc4   :  { %2012 = vmatpush1.bf16.msra.mxu0 %v2011_v12  ;;  %2070 = vmatprep.subr.bf16.mxu1 %v2069_v6  ;;  %v1316_v38 = vld [vmem:[#allocation18 + $0xd8] sm:$0xff]  ;;  %v2073_v39 = vpack.c.bf16 %v1364_v37, %v1362_v33  ;;  %v1363_v41 = vld [vmem:[#allocation18 + $0x250] sm:$0xff]  ;;  %v1366_v42 = vld [vmem:[#allocation18 + $0x268] sm:$0xff] }
 0xfc5   :  { %2014 = vmatprep.subr.bf16.mxu0 %v2013_v2  ;;  %v1368_v43 = vld [vmem:[#allocation18 + $0x278] sm:$0xff]  ;;  %v1313_v45 = vld [vmem:[#allocation18 + $0xc0] sm:$0xff]  ;;  %v1315_v46 = vld [vmem:[#allocation18 + $0xd0] sm:$0xff]  ;;  %v2075_v47 = vpack.c.bf16 %v1363_v41, %v1361_v40  ;;  %v2025_v48 = vpack.c.bf16 %v1316_v38, %v1314_v36 }
 0xfc6   :  { %v1318_v49 = vld [vmem:[#allocation18 + $0xe8] sm:$0xff]  ;;  %v2077_v50 = vpack.c.bf16 %v1368_v43, %v1366_v42  ;;  %v1365_v51 = vld [vmem:[#allocation18 + $0x260] sm:$0xff]  ;;  %v1367_v52 = vld [vmem:[#allocation18 + $0x270] sm:$0xff]  ;;  %v2027_v56 = vpack.c.bf16 %v1315_v46, %v1313_v45 }
 0xfc7   :  { %2072 = vmatpush1.bf16.msra.mxu1 %v2071_v32  ;;  %v1320_v53 = vld [vmem:[#allocation18 + $0xf8] sm:$0xff]  ;;  %v1370_v54 = vld [vmem:[#allocation18 + $0x288] sm:$0xff]  ;;  %v1317_v57 = vld [vmem:[#allocation18 + $0xe0] sm:$0xff]  ;;  %v2079_v59 = vpack.c.bf16 %v1367_v52, %v1365_v51 }
 0xfc8   :  { %2016 = vmatpush1.bf16.msra.mxu0 %v2015_v16  ;;  %2074 = vmatprep.subr.bf16.mxu1 %v2073_v39  ;;  %v1372_v55 = vld [vmem:[#allocation18 + $0x298] sm:$0xff]  ;;  %v1319_v58 = vld [vmem:[#allocation18 + $0xf0] sm:$0xff]  ;;  %v2029_v60 = vpack.c.bf16 %v1320_v53, %v1318_v49  ;;  %v1322_v61 = vld [vmem:[#allocation18 + $0x108] sm:$0xff] }
 0xfc9   :  { %2018 = vmatprep.subr.bf16.mxu0 %v2017_v20  ;;  %v2081_v62 = vpack.c.bf16 %v1372_v55, %v1370_v54  ;;  %v1369_v63 = vld [vmem:[#allocation18 + $0x280] sm:$0xff]  ;;  %v1371_v1 = vld [vmem:[#allocation18 + $0x290] sm:$0xff]  ;;  %v1324_v7 = vld [vmem:[#allocation18 + $0x118] sm:$0xff]  ;;  %v2031_v10 = vpack.c.bf16 %v1319_v58, %v1317_v57 }
 0xfca   :  { %v1374_v8 = vld [vmem:[#allocation18 + $0x2a8] sm:$0xff]  ;;  %v1376_v9 = vld [vmem:[#allocation18 + $0x2b8] sm:$0xff]  ;;  %v1321_v11 = vld [vmem:[#allocation18 + $0x100] sm:$0xff]  ;;  %v2083_v2 = vpack.c.bf16 %v1371_v1, %v1369_v63  ;;  %v2033_v3 = vpack.c.bf16 %v1324_v7, %v1322_v61 }
 0xfcb   :  { %2076 = vmatpush1.bf16.msra.mxu1 %v2075_v47  ;;  %v1323_v12 = vld [vmem:[#allocation18 + $0x110] sm:$0xff]  ;;  %v1326_v4 = vld [vmem:[#allocation18 + $0x128] sm:$0xff]  ;;  %v2085_v5 = vpack.c.bf16 %v1376_v9, %v1374_v8  ;;  %v1373_v13 = vld [vmem:[#allocation18 + $0x2a0] sm:$0xff] }
 0xfcc   :  { %2020 = vmatpush1.bf16.msra.mxu0 %v2019_v30  ;;  %2078 = vmatprep.subr.bf16.mxu1 %v2077_v50  ;;  %v1375_v14 = vld [vmem:[#allocation18 + $0x2b0] sm:$0xff]  ;;  %v1328_v15 = vld [vmem:[#allocation18 + $0x138] sm:$0xff]  ;;  %v1378_v16 = vld [vmem:[#allocation18 + $0x2c8] sm:$0xff]  ;;  %v2035_v18 = vpack.c.bf16 %v1323_v12, %v1321_v11 }
 0xfcd   :  { %2022 = vmatprep.subr.bf16.mxu0 %v2021_v34  ;;  %v1380_v17 = vld [vmem:[#allocation18 + $0x2d8] sm:$0xff]  ;;  %v1325_v19 = vld [vmem:[#allocation18 + $0x120] sm:$0xff]  ;;  %v1327_v20 = vld [vmem:[#allocation18 + $0x130] sm:$0xff]  ;;  %v2087_v21 = vpack.c.bf16 %v1375_v14, %v1373_v13  ;;  %v2037_v23 = vpack.c.bf16 %v1328_v15, %v1326_v4 }
 0xfce   :  { %v1284_v22 = vld [vmem:[#allocation12 + $0x8] sm:$0xff]  ;;  %v1330_v24 = vld [vmem:[#allocation18 + $0x148] sm:$0xff]  ;;  %v2089_v25 = vpack.c.bf16 %v1380_v17, %v1378_v16  ;;  %v1379_v27 = vld [vmem:[#allocation18 + $0x2d0] sm:$0xff]  ;;  %v2039_v30 = vpack.c.bf16 %v1327_v20, %v1325_v19 }
 0xfcf   :  { %2080 = vmatpush1.bf16.msra.mxu1 %v2079_v59  ;;  %v1377_v26 = vld [vmem:[#allocation18 + $0x2c0] sm:$0xff]  ;;  %v1332_v6 = vld [vmem:[#allocation18 + $0x158] sm:$0xff]  ;;  %v1382_v28 = vld [vmem:[#allocation18 + $0x2e8] sm:$0xff]  ;;  %1449 = vmatprep.mubr.f32.mxu0 %v1284_v22 }
 0xfd0   :  { %2024 = vmatpush1.bf16.msra.mxu0 %v2023_v44  ;;  %2082 = vmatprep.subr.bf16.mxu1 %v2081_v62  ;;  %v1384_v29 = vld [vmem:[#allocation18 + $0x2f8] sm:$0xff]  ;;  %v1329_v31 = vld [vmem:[#allocation18 + $0x140] sm:$0xff]  ;;  %v1331_v32 = vld [vmem:[#allocation18 + $0x150] sm:$0xff]  ;;  %v2091_v33 = vpack.c.bf16 %v1379_v27, %v1377_v26  ;;  %v2041_v34 = vpack.c.bf16 %v1332_v6, %v1330_v24 }
 0xfd1   :  { %2026 = vmatprep.subr.bf16.mxu0 %v2025_v48  ;;  %v1334_v35 = vld [vmem:[#allocation18 + $0x168] sm:$0xff]  ;;  %v2093_v36 = vpack.c.bf16 %v1384_v29, %v1382_v28  ;;  %v1381_v37 = vld [vmem:[#allocation18 + $0x2e0] sm:$0xff]  ;;  %v1383_v38 = vld [vmem:[#allocation18 + $0x2f0] sm:$0xff]  ;;  %v2043_v42 = vpack.c.bf16 %v1331_v32, %v1329_v31 }
 0xfd2   :  { %v1336_v39 = vld [vmem:[#allocation18 + $0x178] sm:$0xff]  ;;  %v1666_v40 = vld [vmem:[#allocation19 + $0x80] sm:$0xff]  ;;  %v1667_v41 = vld [vmem:[#allocation19 + $0x88] sm:$0xff]  ;;  %v2095_v43 = vpack.c.bf16 %v1383_v38, %v1381_v37 }
 0xfd3   :  { %2084 = vmatpush1.bf16.msra.mxu1 %v2083_v2  ;;  %v2045_v44 = vpack.c.bf16 %v1336_v39, %v1334_v35  ;;  %v1333_v45 = vld [vmem:[#allocation18 + $0x160] sm:$0xff]  ;;  %v1335_v46 = vld [vmem:[#allocation18 + $0x170] sm:$0xff]  ;;  %v1338_v47 = vld [vmem:[#allocation18 + $0x188] sm:$0xff]  ;;  %v2105_v48 = vpack.c.bf16 %v1667_v41, %v1666_v40 }
 0xfd4   :  { %2028 = vmatpush1.bf16.msra.mxu0 %v2027_v56  ;;  %2086 = vmatprep.subr.bf16.mxu1 %v2085_v5  ;;  %v1340_v49 = vld [vmem:[#allocation18 + $0x198] sm:$0xff]  ;;  %v1650_v50 = vld [vmem:[#allocation19] sm:$0xff]  ;;  %v1651_v51 = vld [vmem:[#allocation19 + $0x8] sm:$0xff]  ;;  %v2047_v54 = vpack.c.bf16 %v1335_v46, %v1333_v45 }
 0xfd5   :  { %2030 = vmatprep.subr.bf16.mxu0 %v2029_v60  ;;  %v1668_v52 = vld [vmem:[#allocation19 + $0x90] sm:$0xff]  ;;  %v1669_v53 = vld [vmem:[#allocation19 + $0x98] sm:$0xff]  ;;  %v1285_v55 = vld [vmem:[#allocation12 + $0x10] sm:$0xff]  ;;  %v2049_v56 = vpack.c.bf16 %v1340_v49, %v1338_v47  ;;  %v2107_v60 = vpack.c.bf16 %v1651_v51, %v1650_v50 }
 0xfd6   :  { %v1337_v57 = vld [vmem:[#allocation18 + $0x180] sm:$0xff]  ;;  %v1339_v58 = vld [vmem:[#allocation18 + $0x190] sm:$0xff]  ;;  %v1342_v59 = vld [vmem:[#allocation18 + $0x1a8] sm:$0xff]  ;;  %v2109_v62 = vpack.c.bf16 %v1669_v53, %v1668_v52 }
 0xfd7   :  { %2088 = vmatpush1.bf16.msra.mxu1 %v2087_v21  ;;  %v1344_v61 = vld [vmem:[#allocation18 + $0x1b8] sm:$0xff]  ;;  %v1652_v63 = vld [vmem:[#allocation19 + $0x10] sm:$0xff]  ;;  %v1670_v7 = vld [vmem:[#allocation19 + $0xa0] sm:$0xff]  ;;  %v2051_v9 = vpack.c.bf16 %v1339_v58, %v1337_v57 }
 0xfd8   :  { %2032 = vmatpush1.bf16.msra.mxu0 %v2031_v10  ;;  %2090 = vmatprep.subr.bf16.mxu1 %v2089_v25  ;;  %v1653_v1 = vld [vmem:[#allocation19 + $0x18] sm:$0xff]  ;;  %v1671_v8 = vld [vmem:[#allocation19 + $0xa8] sm:$0xff]  ;;  %v1288_v10 = vld [vmem:[#allocation12 + $0x28] sm:$0xff]  ;;  %v2053_v11 = vpack.c.bf16 %v1344_v61, %v1342_v59 }
 0xfd9   :  { %2034 = vmatprep.subr.bf16.mxu0 %v2033_v3  ;;  %v1341_v12 = vld [vmem:[#allocation18 + $0x1a0] sm:$0xff]  ;;  %v1343_v2 = vld [vmem:[#allocation18 + $0x1b0] sm:$0xff]  ;;  %v1346_v3 = vld [vmem:[#allocation18 + $0x1c8] sm:$0xff]  ;;  %v2111_v4 = vpack.c.bf16 %v1653_v1, %v1652_v63  ;;  %v2113_v13 = vpack.c.bf16 %v1671_v8, %v1670_v7 }
 0xfda   :  { %v1348_v5 = vld [vmem:[#allocation18 + $0x1d8] sm:$0xff]  ;;  %v1654_v14 = vld [vmem:[#allocation19 + $0x20] sm:$0xff]  ;;  %v1655_v15 = vld [vmem:[#allocation19 + $0x28] sm:$0xff] }
 0xfdb   :  { %2092 = vmatpush1.bf16.msra.mxu1 %v2091_v33  ;;  %v1672_v16 = vld [vmem:[#allocation19 + $0xb0] sm:$0xff]  ;;  %v1673_v17 = vld [vmem:[#allocation19 + $0xb8] sm:$0xff]  ;;  %v2057_v19 = vpack.c.bf16 %v1348_v5, %v1346_v3  ;;  %v1345_v20 = vld [vmem:[#allocation18 + $0x1c0] sm:$0xff] }
 0xfdc   :  { %2036 = vmatpush1.bf16.msra.mxu0 %v2035_v18  ;;  %2094 = vmatprep.subr.bf16.mxu1 %v2093_v36  ;;  %v2055_v18 = vpack.c.bf16 %v1343_v2, %v1341_v12  ;;  %v1347_v21 = vld [vmem:[#allocation18 + $0x1d0] sm:$0xff]  ;;  %v1350_v22 = vld [vmem:[#allocation18 + $0x1e8] sm:$0xff]  ;;  %v1352_v24 = vld [vmem:[#allocation18 + $0x1f8] sm:$0xff]  ;;  %v2117_v25 = vpack.c.bf16 %v1673_v17, %v1672_v16 }
 0xfdd   :  { %2038 = vmatprep.subr.bf16.mxu0 %v2037_v23  ;;  %v2115_v23 = vpack.c.bf16 %v1655_v15, %v1654_v14  ;;  %v1656_v26 = vld [vmem:[#allocation19 + $0x30] sm:$0xff]  ;;  %v1657_v27 = vld [vmem:[#allocation19 + $0x38] sm:$0xff]  ;;  %v2059_v6 = vpack.c.bf16 %v1347_v21, %v1345_v20  ;;  %v2061_v28 = vpack.c.bf16 %v1352_v24, %v1350_v22  ;;  %v1349_v29 = vld [vmem:[#allocation18 + $0x1e0] sm:$0xff]  ;;  %v1624_v15 = vlaneseq }
 0xfde   :  { %v2119_v31 = vpack.c.bf16 %v1657_v27, %v1656_v26  ;;  %v1276_v32 = vld [vmem:[#allocation16 + $0x8] sm:$0xff]  ;;  %v1278_v33 = vld [vmem:[#allocation16 + $0x18] sm:$0xff]  ;;  %v1275_v36 = vld [vmem:[#allocation16] sm:$0xff] }
 0xfdf   :  { %2096 = vmatpush1.bf16.msra.mxu1 %v2095_v43  ;;  %v2097_v35 = vpack.c.bf16 %v1278_v33, %v1276_v32  ;;  %v1277_v37 = vld [vmem:[#allocation16 + $0x10] sm:$0xff]  ;;  %v1280_v38 = vld [vmem:[#allocation16 + $0x28] sm:$0xff]  ;;  %v1282_v39 = vld [vmem:[#allocation16 + $0x38] sm:$0xff]  ;;  %v1625_v16 = vshrl.u32 %v1624_v15, 7 }
 0xfe0   :  { %2040 = vmatpush1.bf16.msra.mxu0 %v2039_v30  ;;  %2106 = vmatprep.subr.bf16.mxu1 %v2105_v48  ;;  %v1351_v30 = vld [vmem:[#allocation18 + $0x1f0] sm:$0xff]  ;;  %v1283_v40 = vld [vmem:[#allocation12] sm:$0xff]  ;;  %v2099_v41 = vpack.c.bf16 %v1277_v37, %v1275_v36  ;;  %v2101_v43 = vpack.c.bf16 %v1282_v39, %v1280_v38  ;;  %v1274_v49 = vld [vmem:[#allocation3 + $0x8] sm:$0xff] }
 0xfe1   :  { %2042 = vmatprep.subr.bf16.mxu0 %v2041_v34  ;;  %v2063_v34 = vpack.c.bf16 %v1351_v30, %v1349_v29  ;;  %v1281_v45 = vld [vmem:[#allocation16 + $0x30] sm:$0xff]  ;;  %v1273_v48 = vld [vmem:[#allocation3] sm:$0xff]  ;;  %v1674_v50 = vld [vmem:[#allocation19 + $0xc0] sm:$0xff]  ;;  %v1626_v21 = vsub.s32 0, %v1625_v16  ;;  %v1630_v24 = vsub.s32 1, %v1625_v16 }
 0xfe2   :  { %1527 = vmatmul.mubr.f32.vlgmr.msra.gmra.mrb[0].mxu1 %v1285_v55  ;;  %v1286_v46 = vld [vmem:[#allocation12 + $0x18] sm:$0xff]  ;;  %v1675_v51 = vld [vmem:[#allocation19 + $0xc8] sm:$0xff]  ;;  %v1658_v53 = vld [vmem:[#allocation19 + $0x40] sm:$0xff] }
 0xfe3   :  { %1532 = vmatprep.mubr.f32.mxu1 %v2493_v0  ;;  %2108 = vmatpush3.bf16.msra.mxu1 %v2107_v60  ;;  %v2121_v52 = vpack.c.bf16 %v1675_v51, %v1674_v50  ;;  %v1677_v57 = vld [vmem:[#allocation19 + $0xd8] sm:$0xff]  ;;  %v1660_v59 = vld [vmem:[#allocation19 + $0x50] sm:$0xff]  ;;  %v1662_v1 = vld [vmem:[#allocation19 + $0x60] sm:$0xff] }
 0xfe4   :  { %2044 = vmatpush1.bf16.msra.mxu0 %v2043_v42  ;;  %2110 = vmatprep.subr.bf16.mxu1 %v2109_v62  ;;  %v1287_v42 = vld [vmem:[#allocation12 + $0x20] sm:$0xff]  ;;  %v1679_v62 = vld [vmem:[#allocation19 + $0xe8] sm:$0xff]  ;;  %v1664_v12 = vld [vmem:[#allocation19 + $0x70] sm:$0xff] }
 0xfe5   :  { %2046 = vmatprep.subr.bf16.mxu0 %v2045_v44  ;;  %v1279_v44 = vld [vmem:[#allocation16 + $0x20] sm:$0xff]  ;;  %v1661_v60 = vld [vmem:[#allocation19 + $0x58] sm:$0xff]  ;;  %v1663_v7 = vld [vmem:[#allocation19 + $0x68] sm:$0xff] }
 0xfe6   :  { %1533 = vmatmul.mubr.f32.gmra.mrb[2].mxu1 %v1288_v10  ;;  %v2103_v47 = vpack.c.bf16 %v1281_v45, %v1279_v44  ;;  %v2127_v61 = vpack.c.bf16 %v1661_v60, %v1660_v59  ;;  %v2131_v8 = vpack.c.bf16 %v1663_v7, %v1662_v1  ;;  %v1681_v10 = vld [vmem:[#allocation19 + $0xf8] sm:$0xff]  ;;  %v1837_v50 = vld [vmem:[%s2926_s11] ss:$0 sm:$0xff] }
 0xfe7   :  { %2112 = vmatpush3.bf16.msra.mxu1 %v2111_v4  ;;  %v1665_v2 = vld [vmem:[#allocation19 + $0x78] sm:$0xff] }
 0xfe8   :  { %2048 = vmatpush1.bf16.msra.mxu0 %v2047_v54  ;;  %2114 = vmatprep.subr.bf16.mxu1 %v2113_v13  ;;  %v1659_v54 = vld [vmem:[#allocation19 + $0x48] sm:$0xff]  ;;  %v2135_v3 = vpack.c.bf16 %v1665_v2, %v1664_v12 }
 0xfe9   :  { %2050 = vmatprep.subr.bf16.mxu0 %v2049_v56  ;;  %v2123_v55 = vpack.c.bf16 %v1659_v54, %v1658_v53  ;;  %v1676_v56 = vld [vmem:[#allocation19 + $0xd0] sm:$0xff] }
 0xfea   :  { %v2125_v58 = vpack.c.bf16 %v1677_v57, %v1676_v56 }
 0xfeb   :  { %2116 = vmatpush3.bf16.msra.mxu1 %v2115_v23  ;;  %v1622_v23 = vld [vmem:[%s2924_s9] sm:$0x3] }
 0xfec   :  { %2052 = vmatpush1.bf16.msra.mxu0 %v2051_v9  ;;  %2118 = vmatprep.subr.bf16.mxu1 %v2117_v25  ;;  %v1680_v9 = vld [vmem:[#allocation19 + $0xf0] sm:$0xff]  ;;  %v1631_v29 = vrot.slane %v1622_v23, %v1630_v24 }
 0xfed   :  { %2054 = vmatprep.subr.bf16.mxu0 %v2053_v11  ;;  %v2133_v11 = vpack.c.bf16 %v1681_v10, %v1680_v9 }
 0xfef   :  { %2120 = vmatpush3.bf16.msra.mxu1 %v2119_v31 }
 0xff0   :  { %2056 = vmatpush1.bf16.msra.mxu0 %v2055_v18  ;;  %2122 = vmatprep.subr.bf16.mxu1 %v2121_v52 }
 0xff1   :  { %2058 = vmatprep.subr.bf16.mxu0 %v2057_v19 }
 0xff3   :  { %2124 = vmatpush3.bf16.msra.mxu1 %v2123_v55 }
 0xff4   :  { %2060 = vmatpush1.bf16.msra.mxu0 %v2059_v6  ;;  %2126 = vmatprep.subr.bf16.mxu1 %v2125_v58  ;;  %v1627_v6 = vrot.slane %v1622_v23, %v1626_v21 }
 0xff5   :  { %2062 = vmatprep.subr.bf16.mxu0 %v2061_v28 }
 0xff7   :  { %2128 = vmatpush3.bf16.msra.mxu1 %v2127_v61 }
 0xff8   :  { %2064 = vmatpush1.bf16.msra.mxu0 %v2063_v34 }
 0xff9   :  { %2098 = vmatprep.subr.bf16.mxu0 %v2097_v35 }
 0xffb   :  { %1450 = vmatmul.mubr.f32.vlgmr.msra.gmra.mrb[0].mxu0 %v1283_v40 }
 0xffc   :  { %2100 = vmatpush1.bf16.msra.mxu0 %v2099_v41  ;;  %1455 = vmatprep.mubr.f32.mxu0 %v1287_v42 }
 0xffd   :  { %2102 = vmatprep.subr.bf16.mxu0 %v2101_v43 }
 0xfff   :  { %1456 = vmatmul.mubr.f32.gmra.mrb[2].mxu0 %v1286_v46 }
0x1000   :  { %2104 = vmatpush1.bf16.msra.mxu0 %v2103_v47  ;;  %1609 = vmatprep.mubr.f32.mxu0 %v2493_v0 }
0x1003   :  { %1835 = vmatmul.mubr.msk.f32.vlgmr.msra.gmra.mrb[4].mxu0 %vm405_vm0, %v1273_v48 }
0x1004   :  { %1615 = vmatprep.mubr.f32.mxu0 %v2493_v0  ;;  %v1678_v0 = vld [vmem:[#allocation19 + $0xe0] sm:$0xff] }
0x1005   :  { %v2129_v63 = vpack.c.bf16 %v1679_v62, %v1678_v0 }
0x1007   :  { %1836 = vmatmul.mubr.msk.f32.gmra.mrb[6].mxu0 %vm405_vm0, %v1274_v49  ;;  %2130 = vmatprep.subr.bf16.mxu1 %v2129_v63 }
0x1008   :  { %2132 = vmatpush3.bf16.msra.mxu1 %v2131_v8 }
0x1009   :  { %2134 = vmatprep.subr.bf16.mxu1 %v2133_v11 }
0x100c   :  { %2136 = vmatpush3.bf16.msra.mxu1 %v2135_v3 }
0x10b5   :  { %v1528_v4 = vpop.f32.mrb[0].mxu1 }
0x10b6   :  { %v1530_v5 = vpop.f32.mrb[1].mxu1 }
0x10b9   :  { %v1534_v13 = vpop.f32.mrb[2].mxu1 }
0x10ba   :  { %v1536_v14 = vpop.f32.mrb[3].mxu1 }
0x10ce   :  { %v1451_v17 = vpop.f32.mrb[0].mxu0 }
0x10cf   :  { %v1529_v18 = vadd.f32 %v1528_v4, %v1451_v17  ;;  %v1453_v19 = vpop.f32.mrb[1].mxu0 }
0x10d0   :  { %v1531_v20 = vadd.f32 %v1530_v5, %v1453_v19 }
0x10d2   :  { %v1457_v22 = vpop.f32.mrb[2].mxu0 }
0x10d3   :  { %v1535_v25 = vadd.f32 %v1534_v13, %v1457_v22  ;;  %v1459_v26 = vpop.f32.mrb[3].mxu0 }
0x10d4   :  { %v1537_v27 = vadd.f32 %v1536_v14, %v1459_v26 }
0x10d6   :  { %v1611_v28 = vpop.f32.mrb[4].mxu0 }
0x10d7   :  { %v1612_v30 = vadd.f32 %v1611_v28, %v1529_v18  ;;  %v1613_v31 = vpop.f32.mrb[5].mxu0 }
0x10d8   :  { %v1614_v32 = vadd.f32 %v1613_v31, %v1531_v20 }
0x10d9   :  { %v1634_v33 = vadd.f32 %v1627_v6, %v1612_v30 }
0x10da   :  { %v1635_v34 = vadd.f32 %v1631_v29, %v1614_v32  ;;  %v1617_v35 = vpop.f32.mrb[6].mxu0 }
0x10db   :  { %v1642_v36 = vmul.f32 0.01, %v1634_v33  ;;  %v1618_v37 = vadd.f32 %v1617_v35, %v1535_v25  ;;  %v1619_v38 = vpop.f32.mrb[7].mxu0  ;;  %vm1638_vm12 = vcmp.gt.f32.partialorder %v1634_v33, 0.0 }
0x10dc   :  { %v1620_v39 = vadd.f32 %v1619_v38, %v1537_v27  ;;  %vm1639_vm13 = vcmp.gt.f32.partialorder %v1635_v34, 0.0  ;;  %v1643_v40 = vmul.f32 0.01, %v1635_v34 }
0x10dd   :  { %v1636_v41 = vadd.f32 %v1627_v6, %v1618_v37  ;;  %v1646_v44 = vsel %vm1638_vm12, %v1634_v33, %v1642_v36 }
0x10de   :  { %v1637_v42 = vadd.f32 %v1631_v29, %v1620_v39  ;;  %v1647_v43 = vsel %vm1639_vm13, %v1635_v34, %v1643_v40 }
0x10df   :  { %1753 = vmatprep.mubr.f32.mxu1 %v1647_v43  ;;  %v1644_v45 = vmul.f32 0.01, %v1636_v41  ;;  %vm1640_vm15 = vcmp.gt.f32.partialorder %v1636_v41, 0.0 }
0x10e0   :  { %1754 = vmatmul.mubr.f32.vlgmr.msra.gmra.mrb[4].mxu1 %v1646_v44  ;;  %vm1641_vm14 = vcmp.gt.f32.partialorder %v1637_v42, 0.0  ;;  %v1645_v46 = vmul.f32 0.01, %v1637_v42 }
0x10e1   :  { %v1648_v48 = vsel %vm1640_vm15, %v1636_v41, %v1644_v45 }
0x10e2   :  { %v1649_v47 = vsel %vm1641_vm14, %v1637_v42, %v1645_v46 }
0x10e3   :  { %1758 = vmatprep.mubr.f32.mxu1 %v1649_v47 }
0x10e4   :  { %1759 = vmatmul.mubr.f32.gmra.mrb[6].mxu1 %v1648_v48 }
0x11b3   :  { %v1900_v49 = vpop.f32.mrb[4].mxu1 }
0x11b4   :  { %v1901_v51 = vpop.f32.mrb[5].mxu1 }
0x11b5   :  { %v1902_v52 = vadd.f32 %v1901_v51, %v1900_v49 }
0x11b7   :  { %v1756_v53 = vadd.f32 %v1902_v52, %v1837_v50  ;;  %v1903_v54 = vpop.f32.mrb[6].mxu1 }
0x11b8   :  { %v1904_v55 = vpop.f32.mrb[7].mxu1 }
0x11b9   :  { %v1905_v56 = vadd.f32 %v1904_v55, %v1903_v54  ;;  %vm1764_vm0 = vcmp.gt.f32.partialorder %v1756_v53, 0.0  ;;  %v1766_v57 = vmul.f32 0.01, %v1756_v53 }
0x11bb   :  { %v1761_v58 = vadd.f32 %v1905_v56, %v1837_v50  ;;  %v1768_v59 = vsel %vm1764_vm0, %v1756_v53, %v1766_v57 }
0x11bc   :  { %1770 = vst [vmem:[#allocation21] sm:$0xff] %v1768_v59 }
0x11bd   :  { %vm1765_vm1 = vcmp.gt.f32.partialorder %v1761_v58, 0.0  ;;  %v1767_v60 = vmul.f32 0.01, %v1761_v58 }
0x11bf   :  { %v1769_v61 = vsel %vm1765_vm1, %v1761_v58, %v1767_v60 }
0x11c0   :  { %1771 = vst [vmem:[#allocation21 + $0x8] sm:$0xff] %v1769_v61 }
0x11c1   :  { %2454 = shalt.err (!%p2451_p3)
}
0x11c2   :  { %s2455_s21 = scalar_lea.hbm %s2927_s12, 256 }
0x11c3   :  { %p2456_p4 = scmp.ne.s32.totalorder %s2927_s12, %s2455_s21  ;;  %p2459_p5 = scmp.lt.u32.totalorder %s2455_s21, %s2927_s12 }
0x11c5   :  { %p2461_p6 = pnand %p2459_p5, %p2456_p4 }
0x11c7   :  { %2464 = shalt.err (!%p2461_p6)
}
0x11c8   :  { %1783 = dma.vmem_to_hbm [thread:$0]  %s1778_s22, 256, %s2927_s12, [#allocation9], %s2479_s15, %s2479_s15, %s2480_s16  }
0x11c9   :  { %2475 = dma.done.wait [#allocation9], 256  }
0x11ca   :  { %2476 = vsyncadd [#allocation9], 4294967040 }
0x11cb   :  { %1787 = vsyncpa [#allocation8], 1 }
0x11cc   :  { %1788 = vsyncpa [#allocation11], 1 }
0x11cd   :  { %1789 = vsyncpa [#allocation14], 1 }
0x11ce   :  { %1790 = vsyncpa [#allocation17], 1 }
0x11cf   :  { %1791 = vsyncpa [#allocation20], 1 }
0x11d0   :  { %1792 = vsyncpa [#allocation9], 1 }

</bundles_post_ra>
